<compile_context>
chip_gen: v6e
topology: v6e:2x2x1
jax: 0.10.0
libtpu: 0.0.40
codegen_flags: <defaults>
</compile_context>

<pallas_src>
import functools

import jax
import jax.numpy as jnp
from jax import lax
from jax.experimental import pallas as pl
from jax.experimental.pallas import tpu as pltpu

C_OUT = 32   # conv output channels (fixed by the module)
KH = KW = 3  # conv kernel size (fixed by the module)


# ------------------------------ fused kernel -------------------------------

def _conv_relu_pool_kernel(x_ref, w_ref, o_ref, *, Wh, S, Ho, Wo, Bt):
    """Fused Conv2d(1->32, 3x3, valid) + ReLU + MaxPool2d(2,2) for Bt images.

    x_ref: (Bt, 2, Lf)       even/odd-column image halves, rows flattened
                             (halves[b, p, r*Wh + m] = img[b, r, 2*m + p]),
                             zero padded with one extra row.
    w_ref: (32, 16)          packed params: columns 0..8 = conv taps
                             (tap t = kh*3+kw), column 9 = bias, rest padding.
    o_ref: (Bt, 32, Ho*Wo)   pooled output, NCHW with spatial flattened.
    """
    w_all = w_ref[...]                                   # (32, 16), resident
    bias = w_all[:, KH * KW:KH * KW + 1]                 # (32, 1)

    @pl.loop(0, Bt)
    def _(b):
        # Two accumulators = the two pool-column parities; kept in vregs.
        acc0 = jnp.zeros((C_OUT, S), jnp.float32)        # conv col = 2*oj
        acc1 = jnp.zeros((C_OUT, S), jnp.float32)        # conv col = 2*oj + 1
        for kh in range(KH):
            # The 4 distinct (column-parity p, column-offset q) taps of this
            # kernel row. Each is a contiguous lane slice, loaded exactly once
            # and shared by both parities.
            taps = {
                (p, q): x_ref[b, p:p + 1, pl.ds(kh * Wh + q, S)]   # (1, S)
                for (p, q) in ((0, 0), (1, 0), (0, 1), (1, 1))
            }
            for kw in range(KW):
                t = kh * KW + kw
                # One lane-splat of the weight column, reused for both
                # parities (broadcast_in_dim is not CSE'd, so hoist it).
                w_b = jnp.broadcast_to(w_all[:, t:t + 1], (C_OUT, S))
                acc0 = acc0 + w_b * taps[(kw % 2, kw // 2)]
                acc1 = acc1 + w_b * taps[((kw + 1) % 2, (kw + 1) // 2)]

        # Horizontal half of the 2x2 max pool (pure elementwise, in vregs):
        #   h[c, i*Wh + oj] = max_dj conv_nobias[c, i, 2*oj + dj]
        h = jnp.maximum(acc0, acc1)                      # (32, S)

        # Vertical half + bias + ReLU; assemble the pooled map lane-dense in
        # registers and write it with a single store (already NCHW order).
        # Lane oj = Wh-1 of h holds garbage (padding-derived); it is never
        # selected below because Wo <= Wh-1.
        rows = []
        for oi in range(Ho):
            top = h[:, 2 * Wh * oi:2 * Wh * oi + Wo]               # conv row 2*oi
            bot = h[:, 2 * Wh * oi + Wh:2 * Wh * oi + Wh + Wo]     # conv row 2*oi+1
            rows.append(jnp.maximum(top, bot))
        pooled = jnp.concatenate(rows, axis=1)                     # (32, Ho*Wo)

        # bias + ReLU AFTER the max is equivalent to the reference's
        # maxpool(relu(conv + bias)): both are monotonic per channel.
        o_ref[b] = jnp.maximum(pooled + bias, 0.0)


# ------------------------------ model forward ------------------------------

def model_forward(x, params, *, bt=8):
    """x: (B, 1, H, W) NCHW -> (B, 32, (H-2)//2, (W-2)//2), matching PyTorch."""
    B, Cin, H, W = x.shape
    assert Cin == 1, "module is Conv2d(in_channels=1, ...)"
    Hc, Wc = H - KH + 1, W - KW + 1
    Ho, Wo = Hc // 2, Wc // 2
    assert Ho >= 1 and Wo >= 1, "input too small for conv3x3 + pool2x2"

    Bt = min(bt, B)                       # images per grid step
    Bp = Bt * pl.cdiv(B, Bt)              # batch padded to a multiple of Bt

    w_pad = W % 2                         # pad width to even for the halves
    Wh = (W + w_pad) // 2                 # half-width
    Hf = H + 1                            # +1 zero row so kh=2 taps stay in bounds
    Lf = Hf * Wh                          # flattened half length
    S = Hc * Wh                           # conv rows * half-width (lane extent)

    # --- glue: the raw image is rewritten exactly once -----------------------
    # (for very large B this split could be moved inside the kernel to save an
    #  HBM pass on v5e; here it is a single pad + one split-transpose)
    img = x[:, 0].astype(jnp.float32)                              # (B, H, W)
    img = jnp.pad(img, ((0, Bp - B), (0, 1), (0, w_pad)))          # (Bp, Hf, Wp)
    # halves[b, p, r*Wh + m] = img[b, r, 2*m + p]
    halves = img.reshape(Bp, Hf, Wh, 2).transpose(0, 3, 1, 2).reshape(Bp, 2, Lf)

    # --- weights + bias packed into one small lane-last operand --------------
    wp = jnp.zeros((C_OUT, 16), jnp.float32)
    wp = wp.at[:, :KH * KW].set(
        params["conv_w"].astype(jnp.float32).reshape(C_OUT, KH * KW))
    wp = wp.at[:, KH * KW].set(params["conv_b"].astype(jnp.float32))

    kernel = functools.partial(
        _conv_relu_pool_kernel, Wh=Wh, S=S, Ho=Ho, Wo=Wo, Bt=Bt)

    out = pl.pallas_call(
        kernel,
        out_shape=jax.ShapeDtypeStruct((Bp, C_OUT, Ho * Wo), jnp.float32),
        grid_spec=pltpu.PrefetchScalarGridSpec(
            num_scalar_prefetch=0,
            grid=(Bp // Bt,),                                   # Bt images / step
            in_specs=[
                pl.BlockSpec((Bt, 2, Lf), lambda i: (i, 0, 0)),       # image halves
                pl.BlockSpec((C_OUT, 16), lambda i: (0, 0)),          # packed w+b
            ],
            out_specs=pl.BlockSpec((Bt, C_OUT, Ho * Wo), lambda i: (i, 0, 0)),
        ),
        # v7x: with a grid of length >= 2 the batch axis can also be
        # pltpu.CORE_PARALLEL to shard batch tiles across the two TensorCores.
        compiler_params=pltpu.CompilerParams(
            dimension_semantics=("parallel",)),
    )(halves, wp)

    return out[:B].reshape(B, C_OUT, Ho, Wo)       # free reshape, already NCHW


# ---------------------------- pure-JAX reference ----------------------------

def reference_forward(x, params):
    conv = lax.conv_general_dilated(
        x.astype(jnp.float32), params["conv_w"].astype(jnp.float32),
        window_strides=(1, 1), padding="VALID",
        dimension_numbers=("NCHW", "OIHW", "NCHW"),
        precision=lax.Precision.HIGHEST)
    conv = jnp.maximum(conv + params["conv_b"].reshape(1, C_OUT, 1, 1), 0.0)
    return lax.reduce_window(conv, -jnp.inf, lax.max,
                             (1, 1, 2, 2), (1, 1, 2, 2), "VALID")


# ----------------------------------- main -----------------------------------

if __name__ == "__main__":
    key = jax.random.PRNGKey(0)
    pkey, xkey = jax.random.split(key)
    wk, bk = jax.random.split(pkey)

    bound = 1.0 / 3.0  # 1/sqrt(fan_in = 1*3*3), PyTorch default init range
    params = {
        "conv_w": jax.random.uniform(wk, (C_OUT, 1, KH, KW), jnp.float32,
                                     -bound, bound),
        "conv_b": jax.random.uniform(bk, (C_OUT,), jnp.float32, -bound, bound),
    }

    x = jax.random.normal(xkey, (2, 1, 28, 28), jnp.float32)

    out = jax.block_until_ready(jax.jit(model_forward)(x, params))
    ref = jax.block_until_ready(reference_forward(x, params))

    assert out.shape == (2, C_OUT, 13, 13), out.shape
    if not jnp.allclose(out, ref, atol=1e-3, rtol=1e-3):
        max_err = float(jnp.max(jnp.abs(out - ref)))
        raise AssertionError(f"Pallas output mismatch vs reference, max_err={max_err}")
    print("KERNEL_OK")
</pallas_src>

<mosaic_0001>
module attributes {stable_mosaic.version = 11 : i64} {
  func.func @_conv_relu_pool_kernel(%arg0: i32, %arg1: memref<2x2x406xf32, #tpu.memory_space<vmem>>, %arg2: memref<32x16xf32, #tpu.memory_space<vmem>>, %arg3: memref<2x32x169xf32, #tpu.memory_space<vmem>>) attributes {dimension_semantics = [#tpu.dimension_semantics<parallel>], iteration_bounds = array<i64: 1>, scalar_prefetch = 0 : i64, scratch_operands = 0 : i64, tpu.core_type = #tpu.core_type<tc>, window_params = [{transform_indices = @transform_0, window_bounds = array<i64: 2, 2, 406>}, {pipeline_mode = #tpu.pipeline_mode<synchronous>, transform_indices = @transform_1, window_bounds = array<i64: 32, 16>}, {transform_indices = @transform_2, window_bounds = array<i64: 2, 32, 169>}]} {
    %c0 = arith.constant 0 : index
    %c0_0 = arith.constant 0 : index
    %0 = vector.load %arg2[%c0, %c0_0] : memref<32x16xf32, #tpu.memory_space<vmem>>, vector<32x16xf32>
    %1 = vector.extract_strided_slice %0 {offsets = [0, 9], sizes = [32, 1], strides = [1, 1]} : vector<32x16xf32> to vector<32x1xf32>
    %c0_i32 = arith.constant 0 : i32
    %c2_i32 = arith.constant 2 : i32
    %2 = arith.addi %c0_i32, %c2_i32 : i32
    %c1_i32 = arith.constant 1 : i32
    scf.for %arg4 = %c0_i32 to %2 step %c1_i32  : i32 {
      %c1_i32_2 = arith.constant 1 : i32
      %3 = arith.muli %arg4, %c1_i32_2 : i32
      %c0_i32_3 = arith.constant 0 : i32
      %4 = arith.addi %c0_i32_3, %3 : i32
      %cst = arith.constant 0.000000e+00 : f32
      %5 = vector.broadcast %cst : f32 to vector<32x364xf32>
      %cst_4 = arith.constant 0.000000e+00 : f32
      %6 = vector.broadcast %cst_4 : f32 to vector<32x364xf32>
      %7 = arith.index_cast %4 : i32 to index
      %c0_5 = arith.constant 0 : index
      %c0_6 = arith.constant 0 : index
      %8 = vector.load %arg1[%7, %c0_5, %c0_6] : memref<2x2x406xf32, #tpu.memory_space<vmem>>, vector<1x1x364xf32>
      %9 = vector.shape_cast %8 : vector<1x1x364xf32> to vector<1x364xf32>
      %10 = arith.index_cast %4 : i32 to index
      %c1 = arith.constant 1 : index
      %c0_7 = arith.constant 0 : index
      %11 = vector.load %arg1[%10, %c1, %c0_7] : memref<2x2x406xf32, #tpu.memory_space<vmem>>, vector<1x1x364xf32>
      %12 = vector.shape_cast %11 : vector<1x1x364xf32> to vector<1x364xf32>
      %13 = arith.index_cast %4 : i32 to index
      %c0_8 = arith.constant 0 : index
      %c1_9 = arith.constant 1 : index
      %14 = vector.load %arg1[%13, %c0_8, %c1_9] : memref<2x2x406xf32, #tpu.memory_space<vmem>>, vector<1x1x364xf32>
      %15 = vector.shape_cast %14 : vector<1x1x364xf32> to vector<1x364xf32>
      %16 = arith.index_cast %4 : i32 to index
      %c1_10 = arith.constant 1 : index
      %c1_11 = arith.constant 1 : index
      %17 = vector.load %arg1[%16, %c1_10, %c1_11] : memref<2x2x406xf32, #tpu.memory_space<vmem>>, vector<1x1x364xf32>
      %18 = vector.shape_cast %17 : vector<1x1x364xf32> to vector<1x364xf32>
      %19 = vector.extract_strided_slice %0 {offsets = [0, 0], sizes = [32, 1], strides = [1, 1]} : vector<32x16xf32> to vector<32x1xf32>
      %20 = vector.shape_cast %19 : vector<32x1xf32> to vector<32x1xf32>
      %21 = vector.broadcast %20 : vector<32x1xf32> to vector<32x364xf32>
      %22 = vector.broadcast %9 : vector<1x364xf32> to vector<32x364xf32>
      %23 = arith.mulf %21, %22 : vector<32x364xf32>
      %24 = arith.addf %5, %23 : vector<32x364xf32>
      %25 = vector.broadcast %12 : vector<1x364xf32> to vector<32x364xf32>
      %26 = arith.mulf %21, %25 : vector<32x364xf32>
      %27 = arith.addf %6, %26 : vector<32x364xf32>
      %28 = vector.extract_strided_slice %0 {offsets = [0, 1], sizes = [32, 1], strides = [1, 1]} : vector<32x16xf32> to vector<32x1xf32>
      %29 = vector.shape_cast %28 : vector<32x1xf32> to vector<32x1xf32>
      %30 = vector.broadcast %29 : vector<32x1xf32> to vector<32x364xf32>
      %31 = vector.broadcast %12 : vector<1x364xf32> to vector<32x364xf32>
      %32 = arith.mulf %30, %31 : vector<32x364xf32>
      %33 = arith.addf %24, %32 : vector<32x364xf32>
      %34 = vector.broadcast %15 : vector<1x364xf32> to vector<32x364xf32>
      %35 = arith.mulf %30, %34 : vector<32x364xf32>
      %36 = arith.addf %27, %35 : vector<32x364xf32>
      %37 = vector.extract_strided_slice %0 {offsets = [0, 2], sizes = [32, 1], strides = [1, 1]} : vector<32x16xf32> to vector<32x1xf32>
      %38 = vector.shape_cast %37 : vector<32x1xf32> to vector<32x1xf32>
      %39 = vector.broadcast %38 : vector<32x1xf32> to vector<32x364xf32>
      %40 = vector.broadcast %15 : vector<1x364xf32> to vector<32x364xf32>
      %41 = arith.mulf %39, %40 : vector<32x364xf32>
      %42 = arith.addf %33, %41 : vector<32x364xf32>
      %43 = vector.broadcast %18 : vector<1x364xf32> to vector<32x364xf32>
      %44 = arith.mulf %39, %43 : vector<32x364xf32>
      %45 = arith.addf %36, %44 : vector<32x364xf32>
      %46 = arith.index_cast %4 : i32 to index
      %c0_12 = arith.constant 0 : index
      %c14 = arith.constant 14 : index
      %47 = vector.load %arg1[%46, %c0_12, %c14] : memref<2x2x406xf32, #tpu.memory_space<vmem>>, vector<1x1x364xf32>
      %48 = vector.shape_cast %47 : vector<1x1x364xf32> to vector<1x364xf32>
      %49 = arith.index_cast %4 : i32 to index
      %c1_13 = arith.constant 1 : index
      %c14_14 = arith.constant 14 : index
      %50 = vector.load %arg1[%49, %c1_13, %c14_14] : memref<2x2x406xf32, #tpu.memory_space<vmem>>, vector<1x1x364xf32>
      %51 = vector.shape_cast %50 : vector<1x1x364xf32> to vector<1x364xf32>
      %52 = arith.index_cast %4 : i32 to index
      %c0_15 = arith.constant 0 : index
      %c15 = arith.constant 15 : index
      %53 = vector.load %arg1[%52, %c0_15, %c15] : memref<2x2x406xf32, #tpu.memory_space<vmem>>, vector<1x1x364xf32>
      %54 = vector.shape_cast %53 : vector<1x1x364xf32> to vector<1x364xf32>
      %55 = arith.index_cast %4 : i32 to index
      %c1_16 = arith.constant 1 : index
      %c15_17 = arith.constant 15 : index
      %56 = vector.load %arg1[%55, %c1_16, %c15_17] : memref<2x2x406xf32, #tpu.memory_space<vmem>>, vector<1x1x364xf32>
      %57 = vector.shape_cast %56 : vector<1x1x364xf32> to vector<1x364xf32>
      %58 = vector.extract_strided_slice %0 {offsets = [0, 3], sizes = [32, 1], strides = [1, 1]} : vector<32x16xf32> to vector<32x1xf32>
      %59 = vector.shape_cast %58 : vector<32x1xf32> to vector<32x1xf32>
      %60 = vector.broadcast %59 : vector<32x1xf32> to vector<32x364xf32>
      %61 = vector.broadcast %48 : vector<1x364xf32> to vector<32x364xf32>
      %62 = arith.mulf %60, %61 : vector<32x364xf32>
      %63 = arith.addf %42, %62 : vector<32x364xf32>
      %64 = vector.broadcast %51 : vector<1x364xf32> to vector<32x364xf32>
      %65 = arith.mulf %60, %64 : vector<32x364xf32>
      %66 = arith.addf %45, %65 : vector<32x364xf32>
      %67 = vector.extract_strided_slice %0 {offsets = [0, 4], sizes = [32, 1], strides = [1, 1]} : vector<32x16xf32> to vector<32x1xf32>
      %68 = vector.shape_cast %67 : vector<32x1xf32> to vector<32x1xf32>
      %69 = vector.broadcast %68 : vector<32x1xf32> to vector<32x364xf32>
      %70 = vector.broadcast %51 : vector<1x364xf32> to vector<32x364xf32>
      %71 = arith.mulf %69, %70 : vector<32x364xf32>
      %72 = arith.addf %63, %71 : vector<32x364xf32>
      %73 = vector.broadcast %54 : vector<1x364xf32> to vector<32x364xf32>
      %74 = arith.mulf %69, %73 : vector<32x364xf32>
      %75 = arith.addf %66, %74 : vector<32x364xf32>
      %76 = vector.extract_strided_slice %0 {offsets = [0, 5], sizes = [32, 1], strides = [1, 1]} : vector<32x16xf32> to vector<32x1xf32>
      %77 = vector.shape_cast %76 : vector<32x1xf32> to vector<32x1xf32>
      %78 = vector.broadcast %77 : vector<32x1xf32> to vector<32x364xf32>
      %79 = vector.broadcast %54 : vector<1x364xf32> to vector<32x364xf32>
      %80 = arith.mulf %78, %79 : vector<32x364xf32>
      %81 = arith.addf %72, %80 : vector<32x364xf32>
      %82 = vector.broadcast %57 : vector<1x364xf32> to vector<32x364xf32>
      %83 = arith.mulf %78, %82 : vector<32x364xf32>
      %84 = arith.addf %75, %83 : vector<32x364xf32>
      %85 = arith.index_cast %4 : i32 to index
      %c0_18 = arith.constant 0 : index
      %c28 = arith.constant 28 : index
      %86 = vector.load %arg1[%85, %c0_18, %c28] : memref<2x2x406xf32, #tpu.memory_space<vmem>>, vector<1x1x364xf32>
      %87 = vector.shape_cast %86 : vector<1x1x364xf32> to vector<1x364xf32>
      %88 = arith.index_cast %4 : i32 to index
      %c1_19 = arith.constant 1 : index
      %c28_20 = arith.constant 28 : index
      %89 = vector.load %arg1[%88, %c1_19, %c28_20] : memref<2x2x406xf32, #tpu.memory_space<vmem>>, vector<1x1x364xf32>
      %90 = vector.shape_cast %89 : vector<1x1x364xf32> to vector<1x364xf32>
      %91 = arith.index_cast %4 : i32 to index
      %c0_21 = arith.constant 0 : index
      %c29 = arith.constant 29 : index
      %92 = vector.load %arg1[%91, %c0_21, %c29] : memref<2x2x406xf32, #tpu.memory_space<vmem>>, vector<1x1x364xf32>
      %93 = vector.shape_cast %92 : vector<1x1x364xf32> to vector<1x364xf32>
      %94 = arith.index_cast %4 : i32 to index
      %c1_22 = arith.constant 1 : index
      %c29_23 = arith.constant 29 : index
      %95 = vector.load %arg1[%94, %c1_22, %c29_23] : memref<2x2x406xf32, #tpu.memory_space<vmem>>, vector<1x1x364xf32>
      %96 = vector.shape_cast %95 : vector<1x1x364xf32> to vector<1x364xf32>
      %97 = vector.extract_strided_slice %0 {offsets = [0, 6], sizes = [32, 1], strides = [1, 1]} : vector<32x16xf32> to vector<32x1xf32>
      %98 = vector.shape_cast %97 : vector<32x1xf32> to vector<32x1xf32>
      %99 = vector.broadcast %98 : vector<32x1xf32> to vector<32x364xf32>
      %100 = vector.broadcast %87 : vector<1x364xf32> to vector<32x364xf32>
      %101 = arith.mulf %99, %100 : vector<32x364xf32>
      %102 = arith.addf %81, %101 : vector<32x364xf32>
      %103 = vector.broadcast %90 : vector<1x364xf32> to vector<32x364xf32>
      %104 = arith.mulf %99, %103 : vector<32x364xf32>
      %105 = arith.addf %84, %104 : vector<32x364xf32>
      %106 = vector.extract_strided_slice %0 {offsets = [0, 7], sizes = [32, 1], strides = [1, 1]} : vector<32x16xf32> to vector<32x1xf32>
      %107 = vector.shape_cast %106 : vector<32x1xf32> to vector<32x1xf32>
      %108 = vector.broadcast %107 : vector<32x1xf32> to vector<32x364xf32>
      %109 = vector.broadcast %90 : vector<1x364xf32> to vector<32x364xf32>
      %110 = arith.mulf %108, %109 : vector<32x364xf32>
      %111 = arith.addf %102, %110 : vector<32x364xf32>
      %112 = vector.broadcast %93 : vector<1x364xf32> to vector<32x364xf32>
      %113 = arith.mulf %108, %112 : vector<32x364xf32>
      %114 = arith.addf %105, %113 : vector<32x364xf32>
      %115 = vector.extract_strided_slice %0 {offsets = [0, 8], sizes = [32, 1], strides = [1, 1]} : vector<32x16xf32> to vector<32x1xf32>
      %116 = vector.shape_cast %115 : vector<32x1xf32> to vector<32x1xf32>
      %117 = vector.broadcast %116 : vector<32x1xf32> to vector<32x364xf32>
      %118 = vector.broadcast %93 : vector<1x364xf32> to vector<32x364xf32>
      %119 = arith.mulf %117, %118 : vector<32x364xf32>
      %120 = arith.addf %111, %119 : vector<32x364xf32>
      %121 = vector.broadcast %96 : vector<1x364xf32> to vector<32x364xf32>
      %122 = arith.mulf %117, %121 : vector<32x364xf32>
      %123 = arith.addf %114, %122 : vector<32x364xf32>
      %124 = arith.maximumf %120, %123 : vector<32x364xf32>
      %125 = vector.extract_strided_slice %124 {offsets = [0, 0], sizes = [32, 13], strides = [1, 1]} : vector<32x364xf32> to vector<32x13xf32>
      %126 = vector.extract_strided_slice %124 {offsets = [0, 14], sizes = [32, 13], strides = [1, 1]} : vector<32x364xf32> to vector<32x13xf32>
      %127 = arith.maximumf %125, %126 : vector<32x13xf32>
      %128 = vector.extract_strided_slice %124 {offsets = [0, 28], sizes = [32, 13], strides = [1, 1]} : vector<32x364xf32> to vector<32x13xf32>
      %129 = vector.extract_strided_slice %124 {offsets = [0, 42], sizes = [32, 13], strides = [1, 1]} : vector<32x364xf32> to vector<32x13xf32>
      %130 = arith.maximumf %128, %129 : vector<32x13xf32>
      %131 = vector.extract_strided_slice %124 {offsets = [0, 56], sizes = [32, 13], strides = [1, 1]} : vector<32x364xf32> to vector<32x13xf32>
      %132 = vector.extract_strided_slice %124 {offsets = [0, 70], sizes = [32, 13], strides = [1, 1]} : vector<32x364xf32> to vector<32x13xf32>
      %133 = arith.maximumf %131, %132 : vector<32x13xf32>
      %134 = vector.extract_strided_slice %124 {offsets = [0, 84], sizes = [32, 13], strides = [1, 1]} : vector<32x364xf32> to vector<32x13xf32>
      %135 = vector.extract_strided_slice %124 {offsets = [0, 98], sizes = [32, 13], strides = [1, 1]} : vector<32x364xf32> to vector<32x13xf32>
      %136 = arith.maximumf %134, %135 : vector<32x13xf32>
      %137 = vector.extract_strided_slice %124 {offsets = [0, 112], sizes = [32, 13], strides = [1, 1]} : vector<32x364xf32> to vector<32x13xf32>
      %138 = vector.extract_strided_slice %124 {offsets = [0, 126], sizes = [32, 13], strides = [1, 1]} : vector<32x364xf32> to vector<32x13xf32>
      %139 = arith.maximumf %137, %138 : vector<32x13xf32>
      %140 = vector.extract_strided_slice %124 {offsets = [0, 140], sizes = [32, 13], strides = [1, 1]} : vector<32x364xf32> to vector<32x13xf32>
      %141 = vector.extract_strided_slice %124 {offsets = [0, 154], sizes = [32, 13], strides = [1, 1]} : vector<32x364xf32> to vector<32x13xf32>
      %142 = arith.maximumf %140, %141 : vector<32x13xf32>
      %143 = vector.extract_strided_slice %124 {offsets = [0, 168], sizes = [32, 13], strides = [1, 1]} : vector<32x364xf32> to vector<32x13xf32>
      %144 = vector.extract_strided_slice %124 {offsets = [0, 182], sizes = [32, 13], strides = [1, 1]} : vector<32x364xf32> to vector<32x13xf32>
      %145 = arith.maximumf %143, %144 : vector<32x13xf32>
      %146 = vector.extract_strided_slice %124 {offsets = [0, 196], sizes = [32, 13], strides = [1, 1]} : vector<32x364xf32> to vector<32x13xf32>
      %147 = vector.extract_strided_slice %124 {offsets = [0, 210], sizes = [32, 13], strides = [1, 1]} : vector<32x364xf32> to vector<32x13xf32>
      %148 = arith.maximumf %146, %147 : vector<32x13xf32>
      %149 = vector.extract_strided_slice %124 {offsets = [0, 224], sizes = [32, 13], strides = [1, 1]} : vector<32x364xf32> to vector<32x13xf32>
      %150 = vector.extract_strided_slice %124 {offsets = [0, 238], sizes = [32, 13], strides = [1, 1]} : vector<32x364xf32> to vector<32x13xf32>
      %151 = arith.maximumf %149, %150 : vector<32x13xf32>
      %152 = vector.extract_strided_slice %124 {offsets = [0, 252], sizes = [32, 13], strides = [1, 1]} : vector<32x364xf32> to vector<32x13xf32>
      %153 = vector.extract_strided_slice %124 {offsets = [0, 266], sizes = [32, 13], strides = [1, 1]} : vector<32x364xf32> to vector<32x13xf32>
      %154 = arith.maximumf %152, %153 : vector<32x13xf32>
      %155 = vector.extract_strided_slice %124 {offsets = [0, 280], sizes = [32, 13], strides = [1, 1]} : vector<32x364xf32> to vector<32x13xf32>
      %156 = vector.extract_strided_slice %124 {offsets = [0, 294], sizes = [32, 13], strides = [1, 1]} : vector<32x364xf32> to vector<32x13xf32>
      %157 = arith.maximumf %155, %156 : vector<32x13xf32>
      %158 = vector.extract_strided_slice %124 {offsets = [0, 308], sizes = [32, 13], strides = [1, 1]} : vector<32x364xf32> to vector<32x13xf32>
      %159 = vector.extract_strided_slice %124 {offsets = [0, 322], sizes = [32, 13], strides = [1, 1]} : vector<32x364xf32> to vector<32x13xf32>
      %160 = arith.maximumf %158, %159 : vector<32x13xf32>
      %161 = vector.extract_strided_slice %124 {offsets = [0, 336], sizes = [32, 13], strides = [1, 1]} : vector<32x364xf32> to vector<32x13xf32>
      %162 = vector.extract_strided_slice %124 {offsets = [0, 350], sizes = [32, 13], strides = [1, 1]} : vector<32x364xf32> to vector<32x13xf32>
      %163 = arith.maximumf %161, %162 : vector<32x13xf32>
      %164 = tpu.concatenate %127, %130, %133, %136, %139, %142, %145, %148, %151, %154, %157, %160, %163 in 1 : vector<32x13xf32>, vector<32x13xf32>, vector<32x13xf32>, vector<32x13xf32>, vector<32x13xf32>, vector<32x13xf32>, vector<32x13xf32>, vector<32x13xf32>, vector<32x13xf32>, vector<32x13xf32>, vector<32x13xf32>, vector<32x13xf32>, vector<32x13xf32> -> vector<32x169xf32>
      %165 = vector.broadcast %1 : vector<32x1xf32> to vector<32x169xf32>
      %166 = arith.addf %164, %165 : vector<32x169xf32>
      %cst_24 = arith.constant 0.000000e+00 : f32
      %167 = vector.broadcast %cst_24 : f32 to vector<32x169xf32>
      %168 = arith.maximumf %166, %167 : vector<32x169xf32>
      %169 = arith.index_cast %4 : i32 to index
      %c0_25 = arith.constant 0 : index
      %c0_26 = arith.constant 0 : index
      %170 = vector.load %arg3[%169, %c0_25, %c0_26] : memref<2x32x169xf32, #tpu.memory_space<vmem>>, vector<1x32x169xf32>
      %171 = vector.shape_cast %170 : vector<1x32x169xf32> to vector<32x169xf32>
      %172 = vector.shape_cast %168 : vector<32x169xf32> to vector<1x32x169xf32>
      tpu.vector_store %arg3[%169, %c0_25, %c0_26], %172 {strides = array<i32>} : memref<2x32x169xf32, #tpu.memory_space<vmem>>, vector<1x32x169xf32>,
    }
    %c2_i32_1 = arith.constant 2 : i32
    return
  }
  func.func @transform_0(%arg0: i32) -> (i32, i32, i32) {
    %c0_i32 = arith.constant 0 : i32
    %c0_i32_0 = arith.constant 0 : i32
    %c0_i32_1 = arith.constant 0 : i32
    return %arg0, %c0_i32, %c0_i32_0 : i32, i32, i32
  }
  func.func @transform_1(%arg0: i32) -> (i32, i32) {
    %c0_i32 = arith.constant 0 : i32
    %c0_i32_0 = arith.constant 0 : i32
    %c0_i32_1 = arith.constant 0 : i32
    return %c0_i32, %c0_i32_0 : i32, i32
  }
  func.func @transform_2(%arg0: i32) -> (i32, i32, i32) {
    %c0_i32 = arith.constant 0 : i32
    %c0_i32_0 = arith.constant 0 : i32
    %c0_i32_1 = arith.constant 0 : i32
    return %arg0, %c0_i32, %c0_i32_0 : i32, i32, i32
  }
}

</mosaic_0001>

<bundles_post_ra>
// kernel: model_forward.1
= control target key start
LH: loop header
LB: loop body
LE: loop exit
PB: predicated region body
PF: predicated region fallthrough
CT: control target
= control target key end

     0   :  { %s2165_s17 = smov 0   ;;  %s3900_s0 = inlined_call_operand.vmem [shape: f32[2,2,406], index: 0, kind: input, shape index: {}]   ;;  %s3901_s1 = inlined_call_operand.vmem [shape: f32[32,16], index: 1, kind: input, shape index: {}]   ;;  %s3902_s2 = inlined_call_operand.vmem [shape: f32[2,32,169], index: 2, kind: output, shape index: {}]  }
   0x1   :  { %v2148_v0 = vld [vmem:[%s3901_s1] sm:$0xff]  ;;  %v2153_v1 = vld [vmem:[%s3901_s1 + $0x8] sm:$0xff]  ;;  %v2158_v2 = vld [vmem:[%s3901_s1 + $0x10] sm:$0xff] }
   0x2   :  { %3996 = vst [vmem:[#allocation2_spill] sm:$0xff] %v2148_v0  ;;  %3997 = vst [vmem:[#allocation3_spill] sm:$0xff] %v2153_v1  ;;  %v2163_v3 = vld [vmem:[%s3901_s1 + $0x18] sm:$0xff] }
   0x3   :  { %3998 = vst [vmem:[#allocation4_spill] sm:$0xff] %v2158_v2  ;;  %3999 = vst [vmem:[#allocation5_spill] sm:$0xff] %v2163_v3 }
   0x4 LB: > { %v2104_v4 = vmov 0   ;;  %v2105_v5 = vmov 1   ;;  %v2106_v6 = vmov 2   ;;  %v2107_v7 = vmov 3   ;;  %s2040_s1 = sshll.u32 %s2102_s17, 3  ;;  %s2109_s21 = smov 127   ;;  %s2102_s17 = sphi %s2165_s17, %s20_s17  }
   0x5   : > { %2077 = vset.pattern.permute.xlu1 %v2104_v4  ;;  %2076 = vset.pattern.permute.xlu0 %v2104_v4  ;;  %v48_v8 = vlaneseq  ;;  %s2196_s20 = scalar_lea.vmem %s3900_s0, %s2040_s1  ;;  %v2108_v15 = vmov 4   ;;  %s2110_s22 = smov 114   ;;  %vm215_vm0 = vcmask 1039360   ;;  %vm488_vm1 = vcmask 932864  }
   0x6   : > { %v24_v17 = vld [vmem:[%s2196_s20] ss:$2 sm:$0x7]  ;;  %v2036_v52 = vld [vmem:[%s2196_s20 + $0x1] ss:$2 sm:$0x7] }
   0x7   : > { %v2191_v11 = vshrl.u32 %v48_v8, 7  ;;  %s2112_s23 = smov 113   ;;  %s2115_s24 = smov 100   ;;  %vm745_vm2 = vcmask 924672   ;;  %vm1057_vm3 = vcmask 818176   ;;  %vm1395_vm4 = vcmask 809984  }
   0x8   : > { %s2117_s25 = smov 99   ;;  %s2119_s26 = smov 98   ;;  %vm1917_vm5 = vcmask 105472   ;;  %vm1922_vm6 = vcmask 211968   ;;  %vm1927_vm7 = vcmask 318464   ;;  %vm1932_vm8 = vcmask 424960  }
   0x9   : > { %v4000_v0 = vld [vmem:[#allocation2_spill] sm:$0xff]  ;;  %v4001_v1 = vld [vmem:[#allocation3_spill] sm:$0xff]  ;;  %v2201_v13 = vsub.s32 1, %v2191_v11  ;;  %v2204_v14 = vsub.s32 0, %v2191_v11  ;;  %v2216_v20 = vsub.s32 2, %v2191_v11  ;;  %s2120_s27 = smov 83  }
   0xa   : > { %v4002_v2 = vld [vmem:[#allocation4_spill] sm:$0xff]  ;;  %v4003_v3 = vld [vmem:[#allocation5_spill] sm:$0xff]  ;;  %29 = vperm.xlu0 %2076, %v4000_v0   ;;  %s2121_s28 = smov 68   ;;  %s2122_s29 = smov 53   ;;  %vm1937_vm9 = vcmask 531456   ;;  %vm1942_vm10 = vcmask 637952  }
   0xb   : > { %39 = vperm.xlu1 %2077, %v4002_v2   ;;  %v2210_v18 = vrot.slane %v24_v17, %v2201_v13  ;;  %v2213_v19 = vrot.slane %v24_v17, %v2204_v14  ;;  %v2231_v26 = vrot.slane %v24_v17, %v2216_v20  ;;  %v2291_v55 = vrot.slane %v2036_v52, %v2204_v14  ;;  %s2123_s30 = smov 38   ;;  %s2124_s3 = smov 23  }
   0xc   : > { %v2294_v56 = vrot.slane %v2036_v52, %v2201_v13  ;;  %v2301_v59 = vrot.slane %v2036_v52, %v2216_v20  ;;  %s2125_s4 = smov 121   ;;  %s2126_s5 = smov 106   ;;  %vm1952_vm11 = vcmask 850944   ;;  %vm1868_vm12 = vcmask 990208  }
   0xd   : > { %s2127_s6 = smov 8   ;;  %s2128_s7 = smov 91   ;;  %vm1947_vm13 = vcmask 744448   ;;  %vm1957_vm14 = vcmask 957440   ;;  %vm1962_vm15 = vcmask 15360  }
   0xe   : > { %34 = vperm.xlu0 %2076, %v4001_v1   ;;  %s2129_s8 = smov 76   ;;  %s2041_s9 = sshll.u32 %s2102_s17, 6 }
   0xf   : > { %44 = vperm.xlu1 %2077, %v4003_v3   ;;  %s3841_s12 = scalar_lea.vmem %s3902_s2, %s2041_s9  ;;  %s20_s17 = sadd.s32 1, %s2102_s17  }
  0x10   : > { %p17_p0 = scmp.ge.s32.totalorder %s20_s17, 2  }
  0x12   : > { %2078 = vset.pattern.permute.xlu0 %v2105_v5 }
  0x13   : > { %2079 = vset.pattern.permute.xlu1 %v2105_v5  ;;  %128 = vperm.xlu0 %2078, %v4000_v0  }
  0x14   : > { %132 = vperm.xlu1 %2079, %v4001_v1  }
  0x17   : > { %140 = vperm.xlu0 %2078, %v4003_v3  }
  0x18   : > { %136 = vperm.xlu1 %2079, %v4002_v2  }
  0x1b   : > { %2081 = vset.pattern.permute.xlu0 %v2106_v6 }
  0x1c   : > { %2080 = vset.pattern.permute.xlu1 %v2106_v6  ;;  %253 = vperm.xlu0 %2081, %v4001_v1  }
  0x1d   : > { %249 = vperm.xlu1 %2080, %v4000_v0  }
  0x20   : > { %2082 = vset.pattern.permute.xlu0 %v2107_v7 }
  0x21   : > { %257 = vperm.xlu1 %2080, %v4002_v2   ;;  %425 = vperm.xlu0 %2082, %v4000_v0  }
  0x25   : > { %261 = vperm.xlu1 %2080, %v4003_v3   ;;  %437 = vperm.xlu0 %2082, %v4003_v3  }
  0x29   : > { %2083 = vset.pattern.permute.xlu1 %v2107_v7  ;;  %2085 = vset.pattern.permute.xlu0 %v2108_v15 }
  0x2a   : > { %429 = vperm.xlu1 %2083, %v4001_v1  }
  0x2e   : > { %433 = vperm.xlu1 %2083, %v4002_v2  }
  0x32   : > { %2084 = vset.pattern.permute.xlu1 %v2108_v15 }
  0x85   : > { %v2187_v9 = vpop.permute.xlu0 %29 }
  0x86   : > { %v2189_v10 = vpop.permute.xlu1 %39 }
  0x89   : > { %v2198_v12 = vpop.permute.xlu0 %34 }
  0x8a   : > { %v2206_v16 = vpop.permute.xlu1 %44 }
  0x8e   : > { %v2218_v21 = vpop.permute.xlu0 %128 }
  0x8f   : > { %v168_v22 = vmul.f32 %v2218_v21, %v2210_v18  ;;  %v167_v23 = vmul.f32 %v2218_v21, %v2213_v19  ;;  %v2224_v24 = vpop.permute.xlu1 %132  ;;  %v169_v27 = vmul.f32 %v2218_v21, %v2231_v26 }
  0x90   : > { %v170_v25 = vmul.f32 %v2224_v24, %v2213_v19  ;;  %v172_v28 = vmul.f32 %v2224_v24, %v2231_v26  ;;  %v171_v29 = vmul.f32 %v2224_v24, %v2210_v18 }
  0x91   : > { %193 = vrot.lane.b32.xlu0 %v168_v22, %s2109_s21  ;;  %191 = vrot.lane.b32.xlu1 %v167_v23, %s2109_s21 }
  0x92   : > { %v2249_v33 = vpop.permute.xlu0 %140 }
  0x93   : > { %v2243_v30 = vpop.permute.xlu1 %136  ;;  %v176_v34 = vmul.f32 %v2249_v33, %v2213_v19  ;;  %v178_v36 = vmul.f32 %v2249_v33, %v2231_v26  ;;  %v177_v37 = vmul.f32 %v2249_v33, %v2210_v18 }
  0x94   : > { %v174_v31 = vmul.f32 %v2243_v30, %v2210_v18  ;;  %v173_v32 = vmul.f32 %v2243_v30, %v2213_v19  ;;  %v175_v35 = vmul.f32 %v2243_v30, %v2231_v26 }
  0x95   : > { %197 = vrot.lane.b32.xlu0 %v170_v25, %s2109_s21  ;;  %195 = vrot.lane.b32.xlu1 %v169_v27, %s2109_s21 }
  0x97   : > { %v254_v41 = vpop.permute.xlu0 %253 }
  0x98   : > { %v250_v38 = vpop.permute.xlu1 %249  ;;  %v267_v42 = vmul.f32 %v254_v41, %v2213_v19  ;;  %v268_v45 = vmul.f32 %v254_v41, %v2210_v18  ;;  %v269_v46 = vmul.f32 %v254_v41, %v2231_v26  ;;  %v347_v61 = vmul.f32 %v254_v41, %v2291_v55 }
  0x99   : > { %201 = vrot.lane.b32.xlu0 %v172_v28, %s2109_s21  ;;  %199 = vrot.lane.b32.xlu1 %v171_v29, %s2109_s21  ;;  %v264_v39 = vmul.f32 %v250_v38, %v2213_v19  ;;  %v265_v40 = vmul.f32 %v250_v38, %v2210_v18  ;;  %v266_v43 = vmul.f32 %v250_v38, %v2231_v26 }
  0x9a   : > { %v344_v57 = vmul.f32 %v250_v38, %v2291_v55  ;;  %v345_v58 = vmul.f32 %v250_v38, %v2294_v56  ;;  %v346_v60 = vmul.f32 %v250_v38, %v2301_v59  ;;  %v348_v62 = vmul.f32 %v254_v41, %v2294_v56 }
  0x9b   : > { %v349_v63 = vmul.f32 %v254_v41, %v2301_v59 }
  0x9c   : > { %v258_v44 = vpop.permute.xlu1 %257  ;;  %v426_v17 = vpop.permute.xlu0 %425 }
  0x9d   : > { %205 = vrot.lane.b32.xlu0 %v174_v31, %s2109_s21  ;;  %203 = vrot.lane.b32.xlu1 %v173_v32, %s2109_s21  ;;  %v270_v47 = vmul.f32 %v258_v44, %v2213_v19  ;;  %v271_v48 = vmul.f32 %v258_v44, %v2210_v18  ;;  %v272_v50 = vmul.f32 %v258_v44, %v2231_v26 }
  0x9e   : > { %v350_v4 = vmul.f32 %v258_v44, %v2291_v55  ;;  %v351_v5 = vmul.f32 %v258_v44, %v2294_v56  ;;  %v352_v6 = vmul.f32 %v258_v44, %v2301_v59  ;;  %v441_v22 = vmul.f32 %v426_v17, %v2210_v18 }
  0x9f   : > { %v440_v23 = vmul.f32 %v426_v17, %v2213_v19  ;;  %v442_v28 = vmul.f32 %v426_v17, %v2231_v26  ;;  %v522_v41 = vmul.f32 %v426_v17, %v2294_v56  ;;  %v523_v44 = vmul.f32 %v426_v17, %v2301_v59 }
  0xa0   : > { %v262_v49 = vpop.permute.xlu1 %261 }
  0xa1   : > { %209 = vrot.lane.b32.xlu0 %v176_v34, %s2109_s21  ;;  %207 = vrot.lane.b32.xlu1 %v175_v35, %s2109_s21  ;;  %v273_v51 = vmul.f32 %v262_v49, %v2213_v19  ;;  %v274_v53 = vmul.f32 %v262_v49, %v2210_v18  ;;  %v275_v54 = vmul.f32 %v262_v49, %v2231_v26 }
  0xa2   : > { %v353_v7 = vmul.f32 %v262_v49, %v2291_v55  ;;  %v354_v8 = vmul.f32 %v262_v49, %v2294_v56  ;;  %v355_v15 = vmul.f32 %v262_v49, %v2301_v59 }
  0xa5   : > { %213 = vrot.lane.b32.xlu0 %v178_v36, %s2109_s21  ;;  %211 = vrot.lane.b32.xlu1 %v177_v37, %s2109_s21  ;;  %v430_v25 = vpop.permute.xlu1 %429  ;;  %v438_v36 = vpop.permute.xlu0 %437 }
  0xa6   : > { %v443_v27 = vmul.f32 %v430_v25, %v2213_v19  ;;  %v445_v29 = vmul.f32 %v430_v25, %v2231_v26  ;;  %v444_v31 = vmul.f32 %v430_v25, %v2210_v18  ;;  %v449_v37 = vmul.f32 %v438_v36, %v2213_v19 }
  0xa7   : > { %v530_v49 = vmul.f32 %v438_v36, %v2291_v55 }
  0xa9   : > { %288 = vrot.lane.b32.xlu0 %v264_v39, %s2109_s21  ;;  %290 = vrot.lane.b32.xlu1 %v265_v40, %s2109_s21  ;;  %v434_v32 = vpop.permute.xlu1 %433  ;;  %v451_v39 = vmul.f32 %v438_v36, %v2231_v26  ;;  %v450_v40 = vmul.f32 %v438_v36, %v2210_v18 }
  0xaa   : > { %v447_v34 = vmul.f32 %v434_v32, %v2210_v18  ;;  %v446_v35 = vmul.f32 %v434_v32, %v2213_v19  ;;  %v448_v38 = vmul.f32 %v434_v32, %v2231_v26 }
  0xad   : > { %292 = vrot.lane.b32.xlu0 %v266_v43, %s2109_s21  ;;  %294 = vrot.lane.b32.xlu1 %v267_v42, %s2109_s21  ;;  %v521_v42 = vmul.f32 %v426_v17, %v2291_v55  ;;  %v524_v43 = vmul.f32 %v430_v25, %v2291_v55 }
  0xb1   : > { %296 = vrot.lane.b32.xlu0 %v268_v45, %s2109_s21  ;;  %298 = vrot.lane.b32.xlu1 %v269_v46, %s2109_s21  ;;  %v526_v45 = vmul.f32 %v430_v25, %v2301_v59  ;;  %v525_v46 = vmul.f32 %v430_v25, %v2294_v56 }
  0xb5   : > { %300 = vrot.lane.b32.xlu0 %v270_v47, %s2109_s21  ;;  %302 = vrot.lane.b32.xlu1 %v271_v48, %s2109_s21  ;;  %v528_v47 = vmul.f32 %v434_v32, %v2294_v56  ;;  %v527_v48 = vmul.f32 %v434_v32, %v2291_v55 }
  0xb9   : > { %304 = vrot.lane.b32.xlu0 %v272_v50, %s2109_s21  ;;  %306 = vrot.lane.b32.xlu1 %v273_v51, %s2109_s21  ;;  %v529_v50 = vmul.f32 %v434_v32, %v2301_v59 }
  0xbd   : > { %308 = vrot.lane.b32.xlu0 %v274_v53, %s2109_s21  ;;  %310 = vrot.lane.b32.xlu1 %v275_v54, %s2109_s21  ;;  %v532_v53 = vmul.f32 %v438_v36, %v2301_v59  ;;  %v531_v54 = vmul.f32 %v438_v36, %v2294_v56 }
  0xc1   : > { %368 = vrot.lane.b32.xlu0 %v344_v57, %s2109_s21  ;;  %370 = vrot.lane.b32.xlu1 %v345_v58, %s2109_s21 }
  0xc5   : > { %372 = vrot.lane.b32.xlu0 %v346_v60, %s2109_s21  ;;  %374 = vrot.lane.b32.xlu1 %v347_v61, %s2109_s21 }
  0xc9   : > { %376 = vrot.lane.b32.xlu0 %v348_v62, %s2109_s21  ;;  %378 = vrot.lane.b32.xlu1 %v349_v63, %s2109_s21 }
  0xcd   : > { %380 = vrot.lane.b32.xlu0 %v350_v4, %s2109_s21  ;;  %382 = vrot.lane.b32.xlu1 %v351_v5, %s2109_s21 }
  0xd1   : > { %384 = vrot.lane.b32.xlu0 %v352_v6, %s2109_s21  ;;  %386 = vrot.lane.b32.xlu1 %v353_v7, %s2109_s21 }
  0xd5   : > { %388 = vrot.lane.b32.xlu0 %v354_v8, %s2109_s21  ;;  %390 = vrot.lane.b32.xlu1 %v355_v15, %s2109_s21 }
  0xd9   : > { %466 = vrot.lane.b32.xlu0 %v441_v22, %s2110_s22  ;;  %464 = vrot.lane.b32.xlu1 %v440_v23, %s2110_s22 }
  0xdd   : > { %470 = vrot.lane.b32.xlu0 %v443_v27, %s2110_s22  ;;  %468 = vrot.lane.b32.xlu1 %v442_v28, %s2110_s22 }
  0xe1   : > { %474 = vrot.lane.b32.xlu0 %v445_v29, %s2110_s22  ;;  %472 = vrot.lane.b32.xlu1 %v444_v31, %s2110_s22 }
  0xe5   : > { %478 = vrot.lane.b32.xlu0 %v447_v34, %s2110_s22  ;;  %476 = vrot.lane.b32.xlu1 %v446_v35, %s2110_s22 }
  0xe9   : > { %482 = vrot.lane.b32.xlu0 %v449_v37, %s2110_s22  ;;  %480 = vrot.lane.b32.xlu1 %v448_v38, %s2110_s22  ;;  %v2111_v37 = vmov 5  }
  0xed   : > { %486 = vrot.lane.b32.xlu0 %v451_v39, %s2110_s22  ;;  %484 = vrot.lane.b32.xlu1 %v450_v40, %s2110_s22 }
  0xf1   : > { %547 = vrot.lane.b32.xlu0 %v522_v41, %s2110_s22  ;;  %545 = vrot.lane.b32.xlu1 %v521_v42, %s2110_s22 }
  0xf5   : > { %551 = vrot.lane.b32.xlu0 %v524_v43, %s2110_s22  ;;  %549 = vrot.lane.b32.xlu1 %v523_v44, %s2110_s22 }
  0xf9   : > { %555 = vrot.lane.b32.xlu0 %v526_v45, %s2110_s22  ;;  %553 = vrot.lane.b32.xlu1 %v525_v46, %s2110_s22 }
  0xfd   : > { %559 = vrot.lane.b32.xlu0 %v528_v47, %s2110_s22  ;;  %557 = vrot.lane.b32.xlu1 %v527_v48, %s2110_s22 }
 0x101   : > { %563 = vrot.lane.b32.xlu0 %v530_v49, %s2110_s22  ;;  %561 = vrot.lane.b32.xlu1 %v529_v50, %s2110_s22 }
 0x103   : > { %v2367_v51 = vpop.permute.xlu0 %193  ;;  %v2369_v52 = vpop.permute.xlu1 %191 }
 0x105   : > { %567 = vrot.lane.b32.xlu0 %v532_v53, %s2110_s22  ;;  %565 = vrot.lane.b32.xlu1 %v531_v54, %s2110_s22 }
 0x107   : > { %v2375_v57 = vpop.permute.xlu0 %197  ;;  %v2377_v58 = vpop.permute.xlu1 %195 }
 0x109   : > { %602 = vperm.xlu1 %2084, %v4000_v0   ;;  %606 = vperm.xlu0 %2085, %v4001_v1  }
 0x10b   : > { %v2381_v60 = vpop.permute.xlu0 %201  ;;  %v2383_v61 = vpop.permute.xlu1 %199 }
 0x10d   : > { %610 = vperm.xlu1 %2084, %v4002_v2   ;;  %2086 = vset.pattern.permute.xlu0 %v2111_v37 }
 0x10f   : > { %v2386_v62 = vpop.permute.xlu0 %205  ;;  %v2388_v63 = vpop.permute.xlu1 %203 }
 0x111   : > { %614 = vperm.xlu1 %2084, %v4003_v3  }
 0x113   : > { %v2391_v4 = vpop.permute.xlu0 %209  ;;  %v2393_v5 = vpop.permute.xlu1 %207 }
 0x115   : > { %2087 = vset.pattern.permute.xlu1 %v2111_v37 }
 0x117   : > { %v2395_v6 = vpop.permute.xlu0 %213  ;;  %v2397_v7 = vpop.permute.xlu1 %211 }
 0x11b   : > { %v2399_v8 = vpop.permute.xlu0 %288  ;;  %v2401_v15 = vpop.permute.xlu1 %290 }
 0x11f   : > { %v2403_v17 = vpop.permute.xlu0 %292  ;;  %v2405_v22 = vpop.permute.xlu1 %294 }
 0x120   : > { %4004 = vst [vmem:[#allocation6_spill] sm:$0xff] %v2405_v22 }
 0x123   : > { %v2407_v23 = vpop.permute.xlu0 %296  ;;  %v2409_v25 = vpop.permute.xlu1 %298 }
 0x124   : > { %4005 = vst [vmem:[#allocation7_spill] sm:$0xff] %v2409_v25 }
 0x127   : > { %v2411_v27 = vpop.permute.xlu0 %300  ;;  %v2413_v28 = vpop.permute.xlu1 %302 }
 0x128   : > { %4006 = vst [vmem:[#allocation8_spill] sm:$0xff] %v2411_v27  ;;  %4007 = vst [vmem:[#allocation9_spill] sm:$0xff] %v2413_v28 }
 0x12b   : > { %v2415_v29 = vpop.permute.xlu0 %304  ;;  %v2417_v31 = vpop.permute.xlu1 %306 }
 0x12c   : > { %4008 = vst [vmem:[#allocation10_spill] sm:$0xff] %v2415_v29  ;;  %4009 = vst [vmem:[#allocation11_spill] sm:$0xff] %v2417_v31  ;;  %v151_v29 = vmul.f32 %v2243_v30, %v2301_v59 }
 0x12f   : > { %v2419_v32 = vpop.permute.xlu0 %308  ;;  %v2421_v34 = vpop.permute.xlu1 %310 }
 0x130   : > { %4010 = vst [vmem:[#allocation12_spill] sm:$0xff] %v2419_v32  ;;  %4011 = vst [vmem:[#allocation13_spill] sm:$0xff] %v2421_v34  ;;  %v72_v34 = vmul.f32 %v2213_v19, %v2206_v16  ;;  %v150_v32 = vmul.f32 %v2243_v30, %v2294_v56 }
 0x133   : > { %v2423_v35 = vpop.permute.xlu0 %368  ;;  %v2425_v36 = vpop.permute.xlu1 %370 }
 0x134   : > { %4012 = vst [vmem:[#allocation14_spill] sm:$0xff] %v2423_v35  ;;  %4013 = vst [vmem:[#allocation15_spill] sm:$0xff] %v2425_v36  ;;  %v149_v36 = vmul.f32 %v2243_v30, %v2291_v55 }
 0x137   : > { %v2427_v38 = vpop.permute.xlu0 %372  ;;  %v2429_v39 = vpop.permute.xlu1 %374 }
 0x138   : > { %4014 = vst [vmem:[#allocation16_spill] sm:$0xff] %v2427_v38  ;;  %4015 = vst [vmem:[#allocation17_spill] sm:$0xff] %v2429_v39 }
 0x13b   : > { %v2431_v40 = vpop.permute.xlu0 %376  ;;  %v2433_v41 = vpop.permute.xlu1 %378 }
 0x13c   : > { %4016 = vst [vmem:[#allocation18_spill] sm:$0xff] %v2431_v40  ;;  %4017 = vst [vmem:[#allocation19_spill] sm:$0xff] %v2433_v41  ;;  %v2037_v40 = vld [vmem:[%s2196_s20 + $0x1] ss:$2 sm:$0xf] }
 0x13d   : > { %v2740_v38 = vrot.slane %v2037_v40, %v2201_v13 }
 0x13f   : > { %v2435_v42 = vpop.permute.xlu0 %380  ;;  %v2437_v43 = vpop.permute.xlu1 %382 }
 0x140   : > { %4018 = vst [vmem:[#allocation20_spill] sm:$0xff] %v2435_v42  ;;  %4019 = vst [vmem:[#allocation21_spill] sm:$0xff] %v2437_v43 }
 0x143   : > { %v2439_v44 = vpop.permute.xlu0 %384  ;;  %v2441_v45 = vpop.permute.xlu1 %386 }
 0x144   : > { %4020 = vst [vmem:[#allocation22_spill] sm:$0xff] %v2439_v44  ;;  %4021 = vst [vmem:[#allocation23_spill] sm:$0xff] %v2441_v45 }
 0x147   : > { %v2443_v46 = vpop.permute.xlu0 %388  ;;  %v2445_v47 = vpop.permute.xlu1 %390 }
 0x148   : > { %4022 = vst [vmem:[#allocation24_spill] sm:$0xff] %v2443_v46  ;;  %4023 = vst [vmem:[#allocation25_spill] sm:$0xff] %v2445_v47 }
 0x14b   : > { %v2447_v48 = vpop.permute.xlu0 %466  ;;  %v2449_v49 = vpop.permute.xlu1 %464 }
 0x14c   : > { %4024 = vst [vmem:[#allocation26_spill] sm:$0xff] %v2447_v48  ;;  %4025 = vst [vmem:[#allocation27_spill] sm:$0xff] %v2449_v49 }
 0x14f   : > { %v2451_v50 = vpop.permute.xlu0 %470  ;;  %v2453_v53 = vpop.permute.xlu1 %468 }
 0x150   : > { %4026 = vst [vmem:[#allocation28_spill] sm:$0xff] %v2451_v50  ;;  %4027 = vst [vmem:[#allocation29_spill] sm:$0xff] %v2453_v53 }
 0x153   : > { %v2455_v54 = vpop.permute.xlu0 %474  ;;  %v2457_v37 = vpop.permute.xlu1 %472 }
 0x154   : > { %4028 = vst [vmem:[#allocation30_spill] sm:$0xff] %v2455_v54  ;;  %4029 = vst [vmem:[#allocation31_spill] sm:$0xff] %v2457_v37 }
 0x157   : > { %v2459_v42 = vpop.permute.xlu0 %478  ;;  %v2461_v44 = vpop.permute.xlu1 %476 }
 0x158   : > { %4030 = vst [vmem:[#allocation32_spill] sm:$0xff] %v2459_v42  ;;  %4031 = vst [vmem:[#allocation33_spill] sm:$0xff] %v2461_v44 }
 0x15b   : > { %v2463_v45 = vpop.permute.xlu0 %482  ;;  %v2465_v46 = vpop.permute.xlu1 %480 }
 0x15c   : > { %4032 = vst [vmem:[#allocation34_spill] sm:$0xff] %v2463_v45  ;;  %4033 = vst [vmem:[#allocation35_spill] sm:$0xff] %v2465_v46 }
 0x15f   : > { %v2467_v47 = vpop.permute.xlu0 %486  ;;  %v2469_v48 = vpop.permute.xlu1 %484 }
 0x160   : > { %4034 = vst [vmem:[#allocation36_spill] sm:$0xff] %v2467_v47  ;;  %4035 = vst [vmem:[#allocation37_spill] sm:$0xff] %v2469_v48 }
 0x163   : > { %v2471_v49 = vpop.permute.xlu0 %547  ;;  %v2473_v50 = vpop.permute.xlu1 %545 }
 0x164   : > { %4036 = vst [vmem:[#allocation38_spill] sm:$0xff] %v2471_v49  ;;  %4037 = vst [vmem:[#allocation39_spill] sm:$0xff] %v2473_v50 }
 0x167   : > { %v2475_v53 = vpop.permute.xlu0 %551  ;;  %v2477_v54 = vpop.permute.xlu1 %549 }
 0x168   : > { %4038 = vst [vmem:[#allocation40_spill] sm:$0xff] %v2475_v53  ;;  %4039 = vst [vmem:[#allocation41_spill] sm:$0xff] %v2477_v54 }
 0x16b   : > { %v2479_v37 = vpop.permute.xlu0 %555  ;;  %v2481_v42 = vpop.permute.xlu1 %553 }
 0x16c   : > { %4040 = vst [vmem:[#allocation42_spill] sm:$0xff] %v2479_v37  ;;  %4041 = vst [vmem:[#allocation43_spill] sm:$0xff] %v2481_v42 }
 0x16f   : > { %v2483_v44 = vpop.permute.xlu0 %559  ;;  %v2485_v45 = vpop.permute.xlu1 %557 }
 0x170   : > { %4042 = vst [vmem:[#allocation44_spill] sm:$0xff] %v2483_v44  ;;  %4043 = vst [vmem:[#allocation45_spill] sm:$0xff] %v2485_v45 }
 0x173   : > { %v2487_v46 = vpop.permute.xlu0 %563  ;;  %v2489_v47 = vpop.permute.xlu1 %561 }
 0x174   : > { %4044 = vst [vmem:[#allocation46_spill] sm:$0xff] %v2487_v46  ;;  %4045 = vst [vmem:[#allocation47_spill] sm:$0xff] %v2489_v47 }
 0x177   : > { %v2491_v48 = vpop.permute.xlu0 %567  ;;  %v2493_v49 = vpop.permute.xlu1 %565 }
 0x178   : > { %4046 = vst [vmem:[#allocation48_spill] sm:$0xff] %v2491_v48  ;;  %4047 = vst [vmem:[#allocation49_spill] sm:$0xff] %v2493_v49 }
 0x184   : > { %v603_v50 = vpop.permute.xlu1 %602  ;;  %v607_v53 = vpop.permute.xlu0 %606 }
 0x185   : > { %v618_v54 = vmul.f32 %v603_v50, %v2294_v56  ;;  %v617_v37 = vmul.f32 %v603_v50, %v2291_v55  ;;  %v620_v45 = vmul.f32 %v607_v53, %v2291_v55  ;;  %v619_v46 = vmul.f32 %v603_v50, %v2301_v59 }
 0x186   : > { %v622_v48 = vmul.f32 %v607_v53, %v2301_v59  ;;  %v621_v49 = vmul.f32 %v607_v53, %v2294_v56 }
 0x187   : > { %643 = vrot.lane.b32.xlu1 %v618_v54, %s2110_s22  ;;  %641 = vrot.lane.b32.xlu0 %v617_v37, %s2110_s22 }
 0x188   : > { %v611_v47 = vpop.permute.xlu1 %610 }
 0x189   : > { %v624_v54 = vmul.f32 %v611_v47, %v2294_v56  ;;  %v623_v37 = vmul.f32 %v611_v47, %v2291_v55 }
 0x18b   : > { %647 = vrot.lane.b32.xlu1 %v620_v45, %s2110_s22  ;;  %645 = vrot.lane.b32.xlu0 %v619_v46, %s2110_s22  ;;  %v625_v45 = vmul.f32 %v611_v47, %v2301_v59 }
 0x18c   : > { %v615_v44 = vpop.permute.xlu1 %614 }
 0x18d   : > { %v626_v46 = vmul.f32 %v615_v44, %v2291_v55 }
 0x18f   : > { %651 = vrot.lane.b32.xlu1 %v622_v48, %s2110_s22  ;;  %649 = vrot.lane.b32.xlu0 %v621_v49, %s2110_s22  ;;  %v627_v48 = vmul.f32 %v615_v44, %v2294_v56  ;;  %v628_v49 = vmul.f32 %v615_v44, %v2301_v59 }
 0x193   : > { %655 = vrot.lane.b32.xlu1 %v624_v54, %s2110_s22  ;;  %653 = vrot.lane.b32.xlu0 %v623_v37, %s2110_s22  ;;  %v697_v54 = vmul.f32 %v603_v50, %v2213_v19  ;;  %v698_v37 = vmul.f32 %v603_v50, %v2210_v18 }
 0x197   : > { %657 = vrot.lane.b32.xlu0 %v625_v45, %s2110_s22  ;;  %659 = vrot.lane.b32.xlu1 %v626_v46, %s2110_s22  ;;  %v699_v45 = vmul.f32 %v603_v50, %v2231_v26  ;;  %v700_v46 = vmul.f32 %v607_v53, %v2213_v19  ;;  %v705_v50 = vmul.f32 %v611_v47, %v2231_v26 }
 0x19b   : > { %661 = vrot.lane.b32.xlu0 %v627_v48, %s2110_s22  ;;  %663 = vrot.lane.b32.xlu1 %v628_v49, %s2110_s22  ;;  %v701_v48 = vmul.f32 %v607_v53, %v2210_v18  ;;  %v702_v49 = vmul.f32 %v607_v53, %v2231_v26  ;;  %v707_v53 = vmul.f32 %v615_v44, %v2210_v18 }
 0x19f   : > { %721 = vrot.lane.b32.xlu0 %v697_v54, %s2112_s23  ;;  %723 = vrot.lane.b32.xlu1 %v698_v37, %s2112_s23  ;;  %v703_v54 = vmul.f32 %v611_v47, %v2213_v19  ;;  %v704_v37 = vmul.f32 %v611_v47, %v2210_v18  ;;  %v2113_v47 = vmov 6  }
 0x1a3   : > { %725 = vrot.lane.b32.xlu0 %v699_v45, %s2112_s23  ;;  %727 = vrot.lane.b32.xlu1 %v700_v46, %s2112_s23  ;;  %v706_v45 = vmul.f32 %v615_v44, %v2213_v19  ;;  %v708_v46 = vmul.f32 %v615_v44, %v2231_v26 }
 0x1a7   : > { %729 = vrot.lane.b32.xlu0 %v701_v48, %s2112_s23  ;;  %731 = vrot.lane.b32.xlu1 %v702_v49, %s2112_s23 }
 0x1ab   : > { %733 = vrot.lane.b32.xlu0 %v703_v54, %s2112_s23  ;;  %735 = vrot.lane.b32.xlu1 %v704_v37, %s2112_s23 }
 0x1af   : > { %737 = vrot.lane.b32.xlu0 %v705_v50, %s2112_s23  ;;  %739 = vrot.lane.b32.xlu1 %v706_v45, %s2112_s23 }
 0x1b3   : > { %741 = vrot.lane.b32.xlu0 %v707_v53, %s2112_s23  ;;  %743 = vrot.lane.b32.xlu1 %v708_v46, %s2112_s23 }
 0x1b7   : > { %779 = vperm.xlu0 %2086, %v4000_v0   ;;  %783 = vperm.xlu1 %2087, %v4001_v1  }
 0x1bb   : > { %791 = vperm.xlu0 %2086, %v4003_v3   ;;  %787 = vperm.xlu1 %2087, %v4002_v2  }
 0x1bf   : > { %2088 = vset.pattern.permute.xlu1 %v2113_v47  ;;  %2089 = vset.pattern.permute.xlu0 %v2113_v47 }
 0x1f9   : > { %v2547_v48 = vpop.permute.xlu0 %641  ;;  %v2549_v49 = vpop.permute.xlu1 %643 }
 0x1fa   : > { %4048 = vst [vmem:[#allocation50_spill] sm:$0xff] %v2547_v48  ;;  %4049 = vst [vmem:[#allocation51_spill] sm:$0xff] %v2549_v49 }
 0x1fd   : > { %v2551_v44 = vpop.permute.xlu0 %645  ;;  %v2553_v54 = vpop.permute.xlu1 %647 }
 0x1fe   : > { %4050 = vst [vmem:[#allocation52_spill] sm:$0xff] %v2551_v44  ;;  %4051 = vst [vmem:[#allocation53_spill] sm:$0xff] %v2553_v54 }
 0x201   : > { %v2555_v37 = vpop.permute.xlu0 %649  ;;  %v2557_v50 = vpop.permute.xlu1 %651 }
 0x202   : > { %4052 = vst [vmem:[#allocation54_spill] sm:$0xff] %v2555_v37  ;;  %4053 = vst [vmem:[#allocation55_spill] sm:$0xff] %v2557_v50 }
 0x205   : > { %v2559_v45 = vpop.permute.xlu0 %653  ;;  %v2561_v53 = vpop.permute.xlu1 %655 }
 0x206   : > { %4054 = vst [vmem:[#allocation56_spill] sm:$0xff] %v2559_v45  ;;  %4055 = vst [vmem:[#allocation57_spill] sm:$0xff] %v2561_v53 }
 0x209   : > { %v2563_v46 = vpop.permute.xlu0 %657  ;;  %v2565_v42 = vpop.permute.xlu1 %659 }
 0x20a   : > { %4056 = vst [vmem:[#allocation58_spill] sm:$0xff] %v2563_v46  ;;  %4057 = vst [vmem:[#allocation59_spill] sm:$0xff] %v2565_v42 }
 0x20d   : > { %v2567_v47 = vpop.permute.xlu0 %661  ;;  %v2569_v48 = vpop.permute.xlu1 %663 }
 0x20e   : > { %4058 = vst [vmem:[#allocation60_spill] sm:$0xff] %v2567_v47  ;;  %4059 = vst [vmem:[#allocation61_spill] sm:$0xff] %v2569_v48 }
 0x211   : > { %v2571_v49 = vpop.permute.xlu0 %721  ;;  %v2573_v44 = vpop.permute.xlu1 %723 }
 0x212   : > { %4060 = vst [vmem:[#allocation62_spill] sm:$0xff] %v2571_v49  ;;  %4061 = vst [vmem:[#allocation63_spill] sm:$0xff] %v2573_v44 }
 0x215   : > { %v2575_v54 = vpop.permute.xlu0 %725  ;;  %v2577_v37 = vpop.permute.xlu1 %727 }
 0x216   : > { %4062 = vst [vmem:[#allocation64_spill] sm:$0xff] %v2575_v54  ;;  %4063 = vst [vmem:[#allocation65_spill] sm:$0xff] %v2577_v37 }
 0x219   : > { %v2579_v50 = vpop.permute.xlu0 %729  ;;  %v2581_v45 = vpop.permute.xlu1 %731 }
 0x21a   : > { %4064 = vst [vmem:[#allocation66_spill] sm:$0xff] %v2579_v50  ;;  %4065 = vst [vmem:[#allocation67_spill] sm:$0xff] %v2581_v45 }
 0x21d   : > { %v2583_v53 = vpop.permute.xlu0 %733  ;;  %v2585_v46 = vpop.permute.xlu1 %735 }
 0x21e   : > { %4066 = vst [vmem:[#allocation68_spill] sm:$0xff] %v2583_v53  ;;  %4067 = vst [vmem:[#allocation69_spill] sm:$0xff] %v2585_v46 }
 0x221   : > { %v2587_v42 = vpop.permute.xlu0 %737  ;;  %v2589_v47 = vpop.permute.xlu1 %739 }
 0x222   : > { %4068 = vst [vmem:[#allocation70_spill] sm:$0xff] %v2587_v42  ;;  %4069 = vst [vmem:[#allocation71_spill] sm:$0xff] %v2589_v47 }
 0x225   : > { %v2591_v48 = vpop.permute.xlu0 %741  ;;  %v2593_v49 = vpop.permute.xlu1 %743 }
 0x226   : > { %4070 = vst [vmem:[#allocation72_spill] sm:$0xff] %v2591_v48  ;;  %4071 = vst [vmem:[#allocation73_spill] sm:$0xff] %v2593_v49 }
 0x232   : > { %v780_v44 = vpop.permute.xlu0 %779  ;;  %v784_v54 = vpop.permute.xlu1 %783 }
 0x233   : > { %v795_v37 = vmul.f32 %v780_v44, %v2210_v18  ;;  %v794_v50 = vmul.f32 %v780_v44, %v2213_v19  ;;  %v797_v53 = vmul.f32 %v784_v54, %v2213_v19  ;;  %v796_v42 = vmul.f32 %v780_v44, %v2231_v26 }
 0x234   : > { %v798_v49 = vmul.f32 %v784_v54, %v2210_v18  ;;  %v799_v47 = vmul.f32 %v784_v54, %v2231_v26 }
 0x235   : > { %820 = vrot.lane.b32.xlu0 %v795_v37, %s2112_s23  ;;  %818 = vrot.lane.b32.xlu1 %v794_v50, %s2112_s23 }
 0x236   : > { %v788_v48 = vpop.permute.xlu1 %787  ;;  %v792_v46 = vpop.permute.xlu0 %791 }
 0x237   : > { %v801_v37 = vmul.f32 %v788_v48, %v2210_v18  ;;  %v800_v50 = vmul.f32 %v788_v48, %v2213_v19 }
 0x239   : > { %822 = vrot.lane.b32.xlu1 %v796_v42, %s2112_s23  ;;  %824 = vrot.lane.b32.xlu0 %v797_v53, %s2112_s23  ;;  %v803_v42 = vmul.f32 %v792_v46, %v2213_v19  ;;  %v802_v53 = vmul.f32 %v788_v48, %v2231_v26 }
 0x23d   : > { %826 = vrot.lane.b32.xlu1 %v798_v49, %s2112_s23  ;;  %828 = vrot.lane.b32.xlu0 %v799_v47, %s2112_s23  ;;  %v805_v49 = vmul.f32 %v792_v46, %v2231_v26  ;;  %v804_v47 = vmul.f32 %v792_v46, %v2210_v18 }
 0x241   : > { %832 = vrot.lane.b32.xlu0 %v801_v37, %s2112_s23  ;;  %830 = vrot.lane.b32.xlu1 %v800_v50, %s2112_s23  ;;  %v875_v37 = vmul.f32 %v780_v44, %v2294_v56  ;;  %v874_v50 = vmul.f32 %v780_v44, %v2291_v55 }
 0x245   : > { %836 = vrot.lane.b32.xlu0 %v803_v42, %s2112_s23  ;;  %834 = vrot.lane.b32.xlu1 %v802_v53, %s2112_s23  ;;  %v877_v42 = vmul.f32 %v784_v54, %v2291_v55  ;;  %v876_v53 = vmul.f32 %v780_v44, %v2301_v59  ;;  %v883_v44 = vmul.f32 %v792_v46, %v2291_v55 }
 0x249   : > { %840 = vrot.lane.b32.xlu0 %v805_v49, %s2112_s23  ;;  %838 = vrot.lane.b32.xlu1 %v804_v47, %s2112_s23  ;;  %v879_v49 = vmul.f32 %v784_v54, %v2301_v59  ;;  %v878_v47 = vmul.f32 %v784_v54, %v2294_v56  ;;  %v885_v54 = vmul.f32 %v792_v46, %v2301_v59 }
 0x24d   : > { %900 = vrot.lane.b32.xlu0 %v875_v37, %s2112_s23  ;;  %898 = vrot.lane.b32.xlu1 %v874_v50, %s2112_s23  ;;  %v881_v37 = vmul.f32 %v788_v48, %v2294_v56  ;;  %v880_v50 = vmul.f32 %v788_v48, %v2291_v55 }
 0x251   : > { %904 = vrot.lane.b32.xlu0 %v877_v42, %s2112_s23  ;;  %902 = vrot.lane.b32.xlu1 %v876_v53, %s2112_s23  ;;  %v882_v42 = vmul.f32 %v788_v48, %v2301_v59  ;;  %v884_v53 = vmul.f32 %v792_v46, %v2294_v56  ;;  %v2114_v48 = vmov 7  }
 0x255   : > { %908 = vrot.lane.b32.xlu0 %v879_v49, %s2112_s23  ;;  %906 = vrot.lane.b32.xlu1 %v878_v47, %s2112_s23 }
 0x259   : > { %912 = vrot.lane.b32.xlu0 %v881_v37, %s2112_s23  ;;  %910 = vrot.lane.b32.xlu1 %v880_v50, %s2112_s23 }
 0x25d   : > { %916 = vrot.lane.b32.xlu0 %v883_v44, %s2112_s23  ;;  %914 = vrot.lane.b32.xlu1 %v882_v42, %s2112_s23 }
 0x261   : > { %920 = vrot.lane.b32.xlu0 %v885_v54, %s2112_s23  ;;  %918 = vrot.lane.b32.xlu1 %v884_v53, %s2112_s23 }
 0x265   : > { %957 = vperm.xlu1 %2088, %v4000_v0   ;;  %961 = vperm.xlu0 %2089, %v4001_v1  }
 0x269   : > { %965 = vperm.xlu1 %2088, %v4002_v2   ;;  %2090 = vset.pattern.permute.xlu0 %v2114_v48 }
 0x26d   : > { %969 = vperm.xlu1 %2088, %v4003_v3  }
 0x271   : > { %2091 = vset.pattern.permute.xlu1 %v2114_v48 }
 0x2a7   : > { %v2647_v49 = vpop.permute.xlu0 %820  ;;  %v2649_v47 = vpop.permute.xlu1 %818 }
 0x2a8   : > { %4072 = vst [vmem:[#allocation74_spill] sm:$0xff] %v2647_v49  ;;  %4073 = vst [vmem:[#allocation75_spill] sm:$0xff] %v2649_v47 }
 0x2ab   : > { %v2651_v46 = vpop.permute.xlu0 %824  ;;  %v2653_v37 = vpop.permute.xlu1 %822 }
 0x2ac   : > { %4074 = vst [vmem:[#allocation76_spill] sm:$0xff] %v2651_v46  ;;  %4075 = vst [vmem:[#allocation77_spill] sm:$0xff] %v2653_v37 }
 0x2af   : > { %v2655_v50 = vpop.permute.xlu0 %828  ;;  %v2657_v44 = vpop.permute.xlu1 %826 }
 0x2b0   : > { %4076 = vst [vmem:[#allocation78_spill] sm:$0xff] %v2655_v50  ;;  %4077 = vst [vmem:[#allocation79_spill] sm:$0xff] %v2657_v44 }
 0x2b3   : > { %v2659_v42 = vpop.permute.xlu0 %832  ;;  %v2661_v54 = vpop.permute.xlu1 %830 }
 0x2b4   : > { %4078 = vst [vmem:[#allocation80_spill] sm:$0xff] %v2659_v42  ;;  %4079 = vst [vmem:[#allocation81_spill] sm:$0xff] %v2661_v54 }
 0x2b7   : > { %v2663_v53 = vpop.permute.xlu0 %836  ;;  %v2665_v48 = vpop.permute.xlu1 %834 }
 0x2b8   : > { %4080 = vst [vmem:[#allocation82_spill] sm:$0xff] %v2663_v53  ;;  %4081 = vst [vmem:[#allocation83_spill] sm:$0xff] %v2665_v48 }
 0x2bb   : > { %v2667_v49 = vpop.permute.xlu1 %838  ;;  %v2669_v47 = vpop.permute.xlu0 %840 }
 0x2bc   : > { %4082 = vst [vmem:[#allocation84_spill] sm:$0xff] %v2667_v49  ;;  %4083 = vst [vmem:[#allocation85_spill] sm:$0xff] %v2669_v47  ;;  %v954_v47 = vld [vmem:[%s2196_s20] ss:$2 sm:$0xf] }
 0x2bf   : > { %v2671_v46 = vpop.permute.xlu1 %898  ;;  %v2673_v37 = vpop.permute.xlu0 %900 }
 0x2c0   : > { %4084 = vst [vmem:[#allocation86_spill] sm:$0xff] %v2671_v46  ;;  %4085 = vst [vmem:[#allocation87_spill] sm:$0xff] %v2673_v37  ;;  %v2695_v37 = vrot.slane %v954_v47, %v2201_v13 }
 0x2c3   : > { %v2675_v50 = vpop.permute.xlu1 %902  ;;  %v2677_v44 = vpop.permute.xlu0 %904 }
 0x2c4   : > { %4086 = vst [vmem:[#allocation88_spill] sm:$0xff] %v2675_v50  ;;  %4087 = vst [vmem:[#allocation89_spill] sm:$0xff] %v2677_v44  ;;  %v2698_v44 = vrot.slane %v954_v47, %v2204_v14 }
 0x2c7   : > { %v2679_v42 = vpop.permute.xlu1 %906  ;;  %v2681_v45 = vpop.permute.xlu0 %908 }
 0x2c8   : > { %4088 = vst [vmem:[#allocation90_spill] sm:$0xff] %v2679_v42  ;;  %4089 = vst [vmem:[#allocation91_spill] sm:$0xff] %v2681_v45  ;;  %v987_v42 = vsub.s32 3, %v2191_v11 }
 0x2ca   : > { %v2705_v50 = vrot.slane %v954_v47, %v987_v42  ;;  %v2749_v35 = vrot.slane %v2037_v40, %v987_v42 }
 0x2cb   : > { %v2683_v54 = vpop.permute.xlu1 %910  ;;  %v2685_v53 = vpop.permute.xlu0 %912 }
 0x2cc   : > { %4090 = vst [vmem:[#allocation92_spill] sm:$0xff] %v2683_v54  ;;  %4091 = vst [vmem:[#allocation93_spill] sm:$0xff] %v2685_v53 }
 0x2cf   : > { %v2687_v48 = vpop.permute.xlu1 %914  ;;  %v2689_v49 = vpop.permute.xlu0 %916 }
 0x2d0   : > { %4092 = vst [vmem:[#allocation94_spill] sm:$0xff] %v2687_v48  ;;  %4093 = vst [vmem:[#allocation95_spill] sm:$0xff] %v2689_v49  ;;  %v2708_v49 = vrot.slane %v954_v47, %v2216_v20 }
 0x2d3   : > { %v2692_v46 = vpop.permute.xlu1 %918  ;;  %v2701_v45 = vpop.permute.xlu0 %920 }
 0x2d4   : > { %4094 = vst [vmem:[#allocation96_spill] sm:$0xff] %v2692_v46  ;;  %4095 = vst [vmem:[#allocation97_spill] sm:$0xff] %v2701_v45 }
 0x2e0   : > { %v958_v54 = vpop.permute.xlu1 %957  ;;  %v962_v46 = vpop.permute.xlu0 %961 }
 0x2e1   : > { %v994_v53 = vmul.f32 %v2695_v37, %v958_v54  ;;  %v993_v48 = vmul.f32 %v2698_v44, %v958_v54  ;;  %v996_v11 = vmul.f32 %v2705_v50, %v958_v54  ;;  %v995_v45 = vmul.f32 %v2708_v49, %v958_v54 }
 0x2e2   : > { %v998_v43 = vmul.f32 %v2695_v37, %v962_v46  ;;  %v997_v41 = vmul.f32 %v2698_v44, %v962_v46  ;;  %v1000_v47 = vmul.f32 %v2705_v50, %v962_v46  ;;  %v1118_v13 = vmul.f32 %v2749_v35, %v958_v54 }
 0x2e3   : > { %1027 = vrot.lane.b32.xlu1 %v994_v53, %s2115_s24  ;;  %1025 = vrot.lane.b32.xlu0 %v993_v48, %s2115_s24  ;;  %v999_v53 = vmul.f32 %v2708_v49, %v962_v46 }
 0x2e4   : > { %v966_v48 = vpop.permute.xlu1 %965 }
 0x2e7   : > { %1031 = vrot.lane.b32.xlu1 %v996_v11, %s2115_s24  ;;  %1029 = vrot.lane.b32.xlu0 %v995_v45, %s2115_s24  ;;  %v1002_v45 = vmul.f32 %v2695_v37, %v966_v48  ;;  %v1001_v11 = vmul.f32 %v2698_v44, %v966_v48 }
 0x2e8   : > { %v970_v39 = vpop.permute.xlu1 %969 }
 0x2eb   : > { %1035 = vrot.lane.b32.xlu1 %v998_v43, %s2115_s24  ;;  %1033 = vrot.lane.b32.xlu0 %v997_v41, %s2115_s24  ;;  %v1004_v41 = vmul.f32 %v2705_v50, %v966_v48  ;;  %v1003_v43 = vmul.f32 %v2708_v49, %v966_v48 }
 0x2ef   : > { %1039 = vrot.lane.b32.xlu1 %v1000_v47, %s2115_s24  ;;  %1037 = vrot.lane.b32.xlu0 %v999_v53, %s2115_s24  ;;  %v1006_v47 = vmul.f32 %v2695_v37, %v970_v39  ;;  %v1005_v53 = vmul.f32 %v2698_v44, %v970_v39 }
 0x2f3   : > { %1043 = vrot.lane.b32.xlu1 %v1002_v45, %s2115_s24  ;;  %1041 = vrot.lane.b32.xlu0 %v1001_v11, %s2115_s24  ;;  %v1008_v45 = vmul.f32 %v2705_v50, %v970_v39  ;;  %v1007_v11 = vmul.f32 %v2708_v49, %v970_v39 }
 0x2f7   : > { %1047 = vrot.lane.b32.xlu1 %v1004_v41, %s2115_s24  ;;  %1045 = vrot.lane.b32.xlu0 %v1003_v43, %s2115_s24  ;;  %v2743_v41 = vrot.slane %v2037_v40, %v2204_v14  ;;  %v1116_v43 = vmul.f32 %v2740_v38, %v958_v54 }
 0x2f9   : > { %v1119_v42 = vmul.f32 %v2743_v41, %v962_v46 }
 0x2fb   : > { %1051 = vrot.lane.b32.xlu1 %v1006_v47, %s2115_s24  ;;  %1049 = vrot.lane.b32.xlu0 %v1005_v53, %s2115_s24  ;;  %v1115_v47 = vmul.f32 %v2743_v41, %v958_v54  ;;  %v2752_v53 = vrot.slane %v2037_v40, %v2216_v20  ;;  %v1122_v20 = vmul.f32 %v2749_v35, %v962_v46 }
 0x2fd   : > { %v1117_v14 = vmul.f32 %v2752_v53, %v958_v54  ;;  %v1121_v40 = vmul.f32 %v2752_v53, %v962_v46  ;;  %v1124_v54 = vmul.f32 %v2740_v38, %v966_v48 }
 0x2ff   : > { %1055 = vrot.lane.b32.xlu1 %v1008_v45, %s2115_s24  ;;  %1053 = vrot.lane.b32.xlu0 %v1007_v11, %s2115_s24  ;;  %v1120_v45 = vmul.f32 %v2740_v38, %v962_v46  ;;  %v1123_v11 = vmul.f32 %v2743_v41, %v966_v48  ;;  %v1128_v46 = vmul.f32 %v2740_v38, %v970_v39 }
 0x303   : > { %1149 = vrot.lane.b32.xlu1 %v1116_v43, %s2115_s24  ;;  %1147 = vrot.lane.b32.xlu0 %v1115_v47, %s2115_s24  ;;  %v1126_v43 = vmul.f32 %v2749_v35, %v966_v48  ;;  %v1125_v47 = vmul.f32 %v2752_v53, %v966_v48  ;;  %v2116_v48 = vmov 8  }
 0x307   : > { %1153 = vrot.lane.b32.xlu1 %v1118_v13, %s2115_s24  ;;  %1151 = vrot.lane.b32.xlu0 %v1117_v14, %s2115_s24  ;;  %v1127_v13 = vmul.f32 %v2743_v41, %v970_v39  ;;  %v1130_v14 = vmul.f32 %v2749_v35, %v970_v39 }
 0x30b   : > { %1157 = vrot.lane.b32.xlu1 %v1120_v45, %s2115_s24  ;;  %1155 = vrot.lane.b32.xlu0 %v1119_v42, %s2115_s24  ;;  %v1129_v45 = vmul.f32 %v2752_v53, %v970_v39 }
 0x30f   : > { %1161 = vrot.lane.b32.xlu1 %v1122_v20, %s2115_s24  ;;  %1159 = vrot.lane.b32.xlu0 %v1121_v40, %s2115_s24 }
 0x313   : > { %1165 = vrot.lane.b32.xlu1 %v1124_v54, %s2115_s24  ;;  %1163 = vrot.lane.b32.xlu0 %v1123_v11, %s2115_s24 }
 0x317   : > { %1169 = vrot.lane.b32.xlu1 %v1126_v43, %s2115_s24  ;;  %1167 = vrot.lane.b32.xlu0 %v1125_v47, %s2115_s24 }
 0x31b   : > { %1173 = vrot.lane.b32.xlu1 %v1128_v46, %s2115_s24  ;;  %1171 = vrot.lane.b32.xlu0 %v1127_v13, %s2115_s24 }
 0x31f   : > { %1177 = vrot.lane.b32.xlu1 %v1130_v14, %s2115_s24  ;;  %1175 = vrot.lane.b32.xlu0 %v1129_v45, %s2115_s24 }
 0x323   : > { %1216 = vperm.xlu0 %2090, %v4000_v0   ;;  %1220 = vperm.xlu1 %2091, %v4001_v1  }
 0x327   : > { %1228 = vperm.xlu0 %2090, %v4003_v3   ;;  %1224 = vperm.xlu1 %2091, %v4002_v2  }
 0x32b   : > { %2092 = vset.pattern.permute.xlu0 %v2116_v48  ;;  %2093 = vset.pattern.permute.xlu1 %v2116_v48 }
 0x355   : > { %v2788_v42 = vpop.permute.xlu0 %1025  ;;  %v2790_v20 = vpop.permute.xlu1 %1027 }
 0x356   : > { %4096 = vst [vmem:[#allocation98_spill] sm:$0xff] %v2788_v42  ;;  %4097 = vst [vmem:[#allocation99_spill] sm:$0xff] %v2790_v20  ;;  %v68_v42 = vmul.f32 %v2231_v26, %v2198_v12  ;;  %v148_v20 = vmul.f32 %v2224_v24, %v2301_v59 }
 0x359   : > { %v2792_v39 = vpop.permute.xlu0 %1029  ;;  %v2794_v40 = vpop.permute.xlu1 %1031 }
 0x35a   : > { %4098 = vst [vmem:[#allocation100_spill] sm:$0xff] %v2792_v39  ;;  %4099 = vst [vmem:[#allocation101_spill] sm:$0xff] %v2794_v40 }
 0x35d   : > { %v2796_v54 = vpop.permute.xlu0 %1033  ;;  %v2798_v11 = vpop.permute.xlu1 %1035 }
 0x35e   : > { %4100 = vst [vmem:[#allocation102_spill] sm:$0xff] %v2796_v54  ;;  %4101 = vst [vmem:[#allocation103_spill] sm:$0xff] %v2798_v11 }
 0x361   : > { %v2800_v43 = vpop.permute.xlu0 %1037  ;;  %v2802_v47 = vpop.permute.xlu1 %1039 }
 0x362   : > { %4102 = vst [vmem:[#allocation104_spill] sm:$0xff] %v2800_v43  ;;  %4103 = vst [vmem:[#allocation105_spill] sm:$0xff] %v2802_v47 }
 0x365   : > { %v2804_v46 = vpop.permute.xlu0 %1041  ;;  %v2806_v13 = vpop.permute.xlu1 %1043 }
 0x366   : > { %4104 = vst [vmem:[#allocation106_spill] sm:$0xff] %v2804_v46  ;;  %4105 = vst [vmem:[#allocation107_spill] sm:$0xff] %v2806_v13 }
 0x369   : > { %v2808_v14 = vpop.permute.xlu0 %1045  ;;  %v2810_v45 = vpop.permute.xlu1 %1047 }
 0x36a   : > { %4106 = vst [vmem:[#allocation108_spill] sm:$0xff] %v2808_v14  ;;  %4107 = vst [vmem:[#allocation109_spill] sm:$0xff] %v2810_v45 }
 0x36d   : > { %v2812_v48 = vpop.permute.xlu0 %1049  ;;  %v2814_v39 = vpop.permute.xlu1 %1051 }
 0x36e   : > { %4108 = vst [vmem:[#allocation110_spill] sm:$0xff] %v2812_v48  ;;  %4109 = vst [vmem:[#allocation111_spill] sm:$0xff] %v2814_v39 }
 0x371   : > { %v2816_v40 = vpop.permute.xlu0 %1053  ;;  %v2818_v54 = vpop.permute.xlu1 %1055 }
 0x372   : > { %4110 = vst [vmem:[#allocation112_spill] sm:$0xff] %v2816_v40  ;;  %4111 = vst [vmem:[#allocation113_spill] sm:$0xff] %v2818_v54 }
 0x375   : > { %v2820_v11 = vpop.permute.xlu0 %1147  ;;  %v2822_v43 = vpop.permute.xlu1 %1149 }
 0x376   : > { %4112 = vst [vmem:[#allocation114_spill] sm:$0xff] %v2820_v11  ;;  %4113 = vst [vmem:[#allocation115_spill] sm:$0xff] %v2822_v43 }
 0x379   : > { %v2824_v47 = vpop.permute.xlu0 %1151  ;;  %v2826_v46 = vpop.permute.xlu1 %1153 }
 0x37a   : > { %4114 = vst [vmem:[#allocation116_spill] sm:$0xff] %v2824_v47  ;;  %4115 = vst [vmem:[#allocation117_spill] sm:$0xff] %v2826_v46 }
 0x37d   : > { %v2828_v13 = vpop.permute.xlu0 %1155  ;;  %v2830_v14 = vpop.permute.xlu1 %1157 }
 0x37e   : > { %4116 = vst [vmem:[#allocation118_spill] sm:$0xff] %v2828_v13  ;;  %4117 = vst [vmem:[#allocation119_spill] sm:$0xff] %v2830_v14 }
 0x381   : > { %v2832_v45 = vpop.permute.xlu0 %1159  ;;  %v2834_v48 = vpop.permute.xlu1 %1161 }
 0x382   : > { %4118 = vst [vmem:[#allocation120_spill] sm:$0xff] %v2832_v45  ;;  %4119 = vst [vmem:[#allocation121_spill] sm:$0xff] %v2834_v48 }
 0x385   : > { %v2836_v39 = vpop.permute.xlu0 %1163  ;;  %v2838_v40 = vpop.permute.xlu1 %1165 }
 0x386   : > { %4120 = vst [vmem:[#allocation122_spill] sm:$0xff] %v2836_v39  ;;  %4121 = vst [vmem:[#allocation123_spill] sm:$0xff] %v2838_v40 }
 0x389   : > { %v2840_v54 = vpop.permute.xlu0 %1167  ;;  %v2842_v11 = vpop.permute.xlu1 %1169 }
 0x38a   : > { %4122 = vst [vmem:[#allocation124_spill] sm:$0xff] %v2840_v54  ;;  %4123 = vst [vmem:[#allocation125_spill] sm:$0xff] %v2842_v11 }
 0x38d   : > { %v2844_v43 = vpop.permute.xlu0 %1171  ;;  %v2846_v47 = vpop.permute.xlu1 %1173 }
 0x38e   : > { %4124 = vst [vmem:[#allocation126_spill] sm:$0xff] %v2844_v43  ;;  %4125 = vst [vmem:[#allocation127_spill] sm:$0xff] %v2846_v47 }
 0x391   : > { %v2848_v46 = vpop.permute.xlu0 %1175  ;;  %v2852_v48 = vpop.permute.xlu1 %1177 }
 0x392   : > { %4126 = vst [vmem:[#allocation128_spill] sm:$0xff] %v2848_v46  ;;  %4127 = vst [vmem:[#allocation129_spill] sm:$0xff] %v2852_v48 }
 0x39e   : > { %v1217_v13 = vpop.permute.xlu0 %1216  ;;  %v1221_v43 = vpop.permute.xlu1 %1220 }
 0x39f   : > { %v1232_v14 = vmul.f32 %v1217_v13, %v2740_v38  ;;  %v1231_v45 = vmul.f32 %v1217_v13, %v2743_v41  ;;  %v1234_v54 = vmul.f32 %v1217_v13, %v2749_v35  ;;  %v1233_v11 = vmul.f32 %v1217_v13, %v2752_v53 }
 0x3a0   : > { %v1236_v46 = vmul.f32 %v1221_v43, %v2740_v38  ;;  %v1235_v47 = vmul.f32 %v1221_v43, %v2743_v41 }
 0x3a1   : > { %1265 = vrot.lane.b32.xlu0 %v1232_v14, %s2115_s24  ;;  %1263 = vrot.lane.b32.xlu1 %v1231_v45, %s2115_s24  ;;  %v1238_v14 = vmul.f32 %v1221_v43, %v2749_v35  ;;  %v1237_v45 = vmul.f32 %v1221_v43, %v2752_v53 }
 0x3a2   : > { %v1225_v48 = vpop.permute.xlu1 %1224  ;;  %v1229_v39 = vpop.permute.xlu0 %1228 }
 0x3a5   : > { %1269 = vrot.lane.b32.xlu0 %v1234_v54, %s2115_s24  ;;  %1267 = vrot.lane.b32.xlu1 %v1233_v11, %s2115_s24  ;;  %v1240_v54 = vmul.f32 %v1225_v48, %v2740_v38  ;;  %v1239_v11 = vmul.f32 %v1225_v48, %v2743_v41 }
 0x3a9   : > { %1273 = vrot.lane.b32.xlu0 %v1236_v46, %s2115_s24  ;;  %1271 = vrot.lane.b32.xlu1 %v1235_v47, %s2115_s24  ;;  %v1242_v46 = vmul.f32 %v1225_v48, %v2749_v35  ;;  %v1241_v47 = vmul.f32 %v1225_v48, %v2752_v53 }
 0x3ad   : > { %1277 = vrot.lane.b32.xlu0 %v1238_v14, %s2115_s24  ;;  %1275 = vrot.lane.b32.xlu1 %v1237_v45, %s2115_s24  ;;  %v1244_v14 = vmul.f32 %v1229_v39, %v2740_v38  ;;  %v1243_v45 = vmul.f32 %v1229_v39, %v2743_v41 }
 0x3b1   : > { %1281 = vrot.lane.b32.xlu0 %v1240_v54, %s2115_s24  ;;  %1279 = vrot.lane.b32.xlu1 %v1239_v11, %s2115_s24  ;;  %v1245_v54 = vmul.f32 %v1229_v39, %v2752_v53  ;;  %v1331_v11 = vmul.f32 %v1217_v13, %v2698_v44 }
 0x3b5   : > { %1285 = vrot.lane.b32.xlu0 %v1242_v46, %s2115_s24  ;;  %1283 = vrot.lane.b32.xlu1 %v1241_v47, %s2115_s24  ;;  %v1333_v46 = vmul.f32 %v1217_v13, %v2708_v49  ;;  %v1246_v47 = vmul.f32 %v1229_v39, %v2749_v35 }
 0x3b9   : > { %1289 = vrot.lane.b32.xlu0 %v1244_v14, %s2115_s24  ;;  %1287 = vrot.lane.b32.xlu1 %v1243_v45, %s2115_s24  ;;  %v1335_v14 = vmul.f32 %v1221_v43, %v2698_v44  ;;  %v1332_v45 = vmul.f32 %v1217_v13, %v2695_v37 }
 0x3bd   : > { %1433 = vperm.xlu0 %2092, %v4000_v0   ;;  %1291 = vrot.lane.b32.xlu1 %v1245_v54, %s2115_s24  ;;  %v1337_v54 = vmul.f32 %v1221_v43, %v2708_v49 }
 0x3c1   : > { %1445 = vperm.xlu0 %2092, %v4003_v3   ;;  %1437 = vperm.xlu1 %2093, %v4001_v1  }
 0x3c5   : > { %1363 = vrot.lane.b32.xlu0 %v1331_v11, %s2117_s25  ;;  %1441 = vperm.xlu1 %2093, %v4002_v2   ;;  %v1334_v11 = vmul.f32 %v1217_v13, %v2705_v50  ;;  %v1343_v13 = vmul.f32 %v1229_v39, %v2698_v44 }
 0x3c9   : > { %1367 = vrot.lane.b32.xlu0 %v1333_v46, %s2117_s25  ;;  %1293 = vrot.lane.b32.xlu1 %v1246_v47, %s2115_s24  ;;  %v1339_v46 = vmul.f32 %v1225_v48, %v2698_v44  ;;  %v1336_v47 = vmul.f32 %v1221_v43, %v2695_v37 }
 0x3cd   : > { %1371 = vrot.lane.b32.xlu0 %v1335_v14, %s2117_s25  ;;  %1365 = vrot.lane.b32.xlu1 %v1332_v45, %s2117_s25  ;;  %v1341_v14 = vmul.f32 %v1225_v48, %v2708_v49  ;;  %v1338_v45 = vmul.f32 %v1221_v43, %v2705_v50  ;;  %v1344_v43 = vmul.f32 %v1229_v39, %v2695_v37 }
 0x3d1   : > { %1375 = vrot.lane.b32.xlu0 %v1337_v54, %s2117_s25  ;;  %1369 = vrot.lane.b32.xlu1 %v1334_v11, %s2117_s25  ;;  %v1340_v54 = vmul.f32 %v1225_v48, %v2695_v37  ;;  %v1345_v11 = vmul.f32 %v1229_v39, %v2708_v49 }
 0x3d5   : > { %1379 = vrot.lane.b32.xlu0 %v1339_v46, %s2117_s25  ;;  %1373 = vrot.lane.b32.xlu1 %v1336_v47, %s2117_s25  ;;  %v1342_v46 = vmul.f32 %v1225_v48, %v2705_v50  ;;  %v1346_v47 = vmul.f32 %v1229_v39, %v2705_v50 }
 0x3d9   : > { %1383 = vrot.lane.b32.xlu0 %v1341_v14, %s2117_s25  ;;  %1377 = vrot.lane.b32.xlu1 %v1338_v45, %s2117_s25 }
 0x3dd   : > { %1387 = vrot.lane.b32.xlu0 %v1343_v13, %s2117_s25  ;;  %1381 = vrot.lane.b32.xlu1 %v1340_v54, %s2117_s25 }
 0x3e1   : > { %1391 = vrot.lane.b32.xlu0 %v1345_v11, %s2117_s25  ;;  %1385 = vrot.lane.b32.xlu1 %v1342_v46, %s2117_s25 }
 0x3e5   : > { %1389 = vrot.lane.b32.xlu1 %v1344_v43, %s2117_s25 }
 0x3e9   : > { %1393 = vrot.lane.b32.xlu1 %v1346_v47, %s2117_s25 }
 0x413   : > { %v2920_v14 = vpop.permute.xlu0 %1265  ;;  %v2922_v45 = vpop.permute.xlu1 %1263 }
 0x414   : > { %4128 = vst [vmem:[#allocation130_spill] sm:$0xff] %v2920_v14  ;;  %4129 = vst [vmem:[#allocation131_spill] sm:$0xff] %v2922_v45  ;;  %v146_v45 = vmul.f32 %v2224_v24, %v2291_v55  ;;  %v147_v14 = vmul.f32 %v2224_v24, %v2294_v56  ;;  %v73_v24 = vmul.f32 %v2210_v18, %v2206_v16 }
 0x417   : > { %v2924_v13 = vpop.permute.xlu0 %1269  ;;  %v2926_v54 = vpop.permute.xlu1 %1267 }
 0x418   : > { %4130 = vst [vmem:[#allocation132_spill] sm:$0xff] %v2924_v13  ;;  %4131 = vst [vmem:[#allocation133_spill] sm:$0xff] %v2926_v54 }
 0x41b   : > { %v2928_v48 = vpop.permute.xlu1 %1271  ;;  %v2930_v11 = vpop.permute.xlu0 %1273 }
 0x41c   : > { %4132 = vst [vmem:[#allocation134_spill] sm:$0xff] %v2928_v48  ;;  %4133 = vst [vmem:[#allocation135_spill] sm:$0xff] %v2930_v11  ;;  %v143_v48 = vmul.f32 %v2218_v21, %v2291_v55  ;;  %v67_v11 = vmul.f32 %v2210_v18, %v2198_v12 }
 0x41e   : > { %v159_v30 = vadd.f32 %v147_v14, %v67_v11  ;;  %v219_v14 = vsel %vm215_vm0, %v2383_v61, %v2381_v60 }
 0x41f   : > { %v2932_v46 = vpop.permute.xlu1 %1275  ;;  %v2934_v3 = vpop.permute.xlu0 %1277 }
 0x420   : > { %4134 = vst [vmem:[#allocation136_spill] sm:$0xff] %v2932_v46  ;;  %4135 = vst [vmem:[#allocation137_spill] sm:$0xff] %v2934_v3 }
 0x423   : > { %v2936_v43 = vpop.permute.xlu1 %1279  ;;  %v2938_v39 = vpop.permute.xlu0 %1281 }
 0x424   : > { %4136 = vst [vmem:[#allocation138_spill] sm:$0xff] %v2936_v43  ;;  %4137 = vst [vmem:[#allocation139_spill] sm:$0xff] %v2938_v39  ;;  %v107_v39 = vmul.f32 %v2294_v56, %v2198_v12 }
 0x427   : > { %v2940_v47 = vpop.permute.xlu1 %1283  ;;  %v2942_v2 = vpop.permute.xlu0 %1285 }
 0x428   : > { %4138 = vst [vmem:[#allocation140_spill] sm:$0xff] %v2940_v47  ;;  %4139 = vst [vmem:[#allocation141_spill] sm:$0xff] %v2942_v2 }
 0x42b   : > { %v2944_v1 = vpop.permute.xlu1 %1287  ;;  %v2946_v0 = vpop.permute.xlu0 %1289 }
 0x42c   : > { %4140 = vst [vmem:[#allocation142_spill] sm:$0xff] %v2944_v1  ;;  %4141 = vst [vmem:[#allocation143_spill] sm:$0xff] %v2946_v0 }
 0x42f   : > { %v2948_v13 = vpop.permute.xlu1 %1291 }
 0x430   : > { %4142 = vst [vmem:[#allocation144_spill] sm:$0xff] %v2948_v13 }
 0x438   : > { %v1434_v54 = vpop.permute.xlu0 %1433 }
 0x439   : > { %v1448_v40 = vmul.f32 %v1434_v54, %v2698_v44  ;;  %v1449_v46 = vmul.f32 %v1434_v54, %v2695_v37  ;;  %v1450_v47 = vmul.f32 %v1434_v54, %v2708_v49  ;;  %v1451_v2 = vmul.f32 %v1434_v54, %v2705_v50 }
 0x43b   : > { %1480 = vrot.lane.b32.xlu0 %v1448_v40, %s2117_s25  ;;  %1482 = vrot.lane.b32.xlu1 %v1449_v46, %s2117_s25 }
 0x43c   : > { %v1438_v3 = vpop.permute.xlu1 %1437  ;;  %v1446_v43 = vpop.permute.xlu0 %1445 }
 0x43d   : > { %v1453_v13 = vmul.f32 %v1438_v3, %v2695_v37  ;;  %v1452_v1 = vmul.f32 %v1438_v3, %v2698_v44  ;;  %v1454_v40 = vmul.f32 %v1438_v3, %v2708_v49 }
 0x43f   : > { %1484 = vrot.lane.b32.xlu0 %v1450_v47, %s2117_s25  ;;  %1486 = vrot.lane.b32.xlu1 %v1451_v2, %s2117_s25  ;;  %v1460_v47 = vmul.f32 %v1446_v43, %v2698_v44 }
 0x440   : > { %v1442_v0 = vpop.permute.xlu1 %1441 }
 0x441   : > { %v1456_v46 = vmul.f32 %v1442_v0, %v2698_v44  ;;  %v1457_v2 = vmul.f32 %v1442_v0, %v2695_v37  ;;  %v1553_v44 = vmul.f32 %v1438_v3, %v2740_v38 }
 0x443   : > { %1490 = vrot.lane.b32.xlu1 %v1453_v13, %s2117_s25  ;;  %1488 = vrot.lane.b32.xlu0 %v1452_v1, %s2117_s25  ;;  %v1461_v13 = vmul.f32 %v1446_v43, %v2695_v37  ;;  %v1548_v1 = vmul.f32 %v1434_v54, %v2743_v41  ;;  %v1557_v37 = vmul.f32 %v1442_v0, %v2740_v38 }
 0x447   : > { %1492 = vrot.lane.b32.xlu0 %v1454_v40, %s2117_s25  ;;  %1496 = vrot.lane.b32.xlu1 %v1456_v46, %s2117_s25  ;;  %v1549_v40 = vmul.f32 %v1434_v54, %v2740_v38  ;;  %v1552_v46 = vmul.f32 %v1438_v3, %v2743_v41 }
 0x44b   : > { %1498 = vrot.lane.b32.xlu0 %v1457_v2, %s2117_s25  ;;  %1504 = vrot.lane.b32.xlu1 %v1460_v47, %s2117_s25  ;;  %v1556_v2 = vmul.f32 %v1442_v0, %v2743_v41  ;;  %v1560_v47 = vmul.f32 %v1446_v43, %v2743_v41  ;;  %v1554_v41 = vmul.f32 %v1438_v3, %v2752_v53 }
 0x44f   : > { %1506 = vrot.lane.b32.xlu0 %v1461_v13, %s2117_s25  ;;  %1580 = vrot.lane.b32.xlu1 %v1548_v1, %s2117_s25  ;;  %v1561_v13 = vmul.f32 %v1446_v43, %v2740_v38  ;;  %v1458_v1 = vmul.f32 %v1442_v0, %v2708_v49  ;;  %v1562_v38 = vmul.f32 %v1446_v43, %v2752_v53 }
 0x453   : > { %1582 = vrot.lane.b32.xlu0 %v1549_v40, %s2117_s25  ;;  %1588 = vrot.lane.b32.xlu1 %v1552_v46, %s2117_s25  ;;  %v1462_v40 = vmul.f32 %v1446_v43, %v2708_v49  ;;  %v1550_v46 = vmul.f32 %v1434_v54, %v2752_v53  ;;  %v1459_v49 = vmul.f32 %v1442_v0, %v2705_v50 }
 0x457   : > { %1590 = vrot.lane.b32.xlu0 %v1553_v44, %s2117_s25  ;;  %1596 = vrot.lane.b32.xlu1 %v1556_v2, %s2117_s25  ;;  %v1558_v44 = vmul.f32 %v1442_v0, %v2752_v53  ;;  %v1455_v2 = vmul.f32 %v1438_v3, %v2705_v50  ;;  %v1559_v53 = vmul.f32 %v1442_v0, %v2749_v35 }
 0x458   : > { %v104_v0 = vmul.f32 %v2294_v56, %v2187_v9 }
 0x45b   : > { %1598 = vrot.lane.b32.xlu0 %v1557_v37, %s2117_s25  ;;  %1604 = vrot.lane.b32.xlu1 %v1560_v47, %s2117_s25  ;;  %v1463_v37 = vmul.f32 %v1446_v43, %v2705_v50  ;;  %v1551_v47 = vmul.f32 %v1434_v54, %v2749_v35  ;;  %v3014_v50 = vpop.permute.xlu1 %1293 }
 0x45c   : > { %4143 = vst [vmem:[#allocation145_spill] sm:$0xff] %v3014_v50  ;;  %v70_v50 = vmul.f32 %v2210_v18, %v2189_v10 }
 0x45f   : > { %1606 = vrot.lane.b32.xlu0 %v1561_v13, %s2117_s25  ;;  %1500 = vrot.lane.b32.xlu1 %v1458_v1, %s2117_s25  ;;  %v1555_v13 = vmul.f32 %v1438_v3, %v2749_v35  ;;  %v1563_v1 = vmul.f32 %v1446_v43, %v2749_v35  ;;  %v105_v35 = vmul.f32 %v2301_v59, %v2187_v9 }
 0x460   : > { %v3032_v43 = vmul.f32 %v2291_v55, %v2189_v10 }
 0x463   : > { %1508 = vrot.lane.b32.xlu0 %v1462_v40, %s2117_s25  ;;  %1584 = vrot.lane.b32.xlu1 %v1550_v46, %s2117_s25  ;;  %v3016_v40 = vpop.permute.xlu0 %1363  ;;  %v3018_v46 = vpop.permute.xlu1 %1365 }
 0x464   : > { %4144 = vst [vmem:[#allocation146_spill] sm:$0xff] %v3016_v40  ;;  %4145 = vst [vmem:[#allocation147_spill] sm:$0xff] %v3018_v46  ;;  %v144_v40 = vmul.f32 %v2218_v21, %v2294_v56  ;;  %v145_v46 = vmul.f32 %v2218_v21, %v2301_v59 }
 0x467   : > { %1592 = vrot.lane.b32.xlu0 %v1554_v41, %s2117_s25  ;;  %1600 = vrot.lane.b32.xlu1 %v1558_v44, %s2117_s25  ;;  %v3020_v54 = vpop.permute.xlu0 %1367  ;;  %v3022_v3 = vpop.permute.xlu1 %1369  ;;  %v103_v41 = vmul.f32 %v2291_v55, %v2187_v9  ;;  %v3036_v44 = vmul.f32 %v2294_v56, %v2189_v10 }
 0x468   : > { %4146 = vst [vmem:[#allocation148_spill] sm:$0xff] %v3020_v54  ;;  %4147 = vst [vmem:[#allocation149_spill] sm:$0xff] %v3022_v3  ;;  %v71_v3 = vmul.f32 %v2231_v26, %v2189_v10  ;;  %v106_v54 = vmul.f32 %v2291_v55, %v2198_v12 }
 0x46b   : > { %1608 = vrot.lane.b32.xlu0 %v1562_v38, %s2117_s25  ;;  %1494 = vrot.lane.b32.xlu1 %v1455_v2, %s2117_s25  ;;  %v3038_v38 = vpop.permute.xlu0 %1371  ;;  %v3040_v2 = vpop.permute.xlu1 %1373 }
 0x46c   : > { %4148 = vst [vmem:[#allocation150_spill] sm:$0xff] %v3038_v38  ;;  %4149 = vst [vmem:[#allocation151_spill] sm:$0xff] %v3040_v2  ;;  %v112_v38 = vmul.f32 %v2291_v55, %v2206_v16  ;;  %v113_v2 = vmul.f32 %v2294_v56, %v2206_v16 }
 0x46f   : > { %1502 = vrot.lane.b32.xlu0 %v1459_v49, %s2117_s25  ;;  %1510 = vrot.lane.b32.xlu1 %v1463_v37, %s2117_s25  ;;  %v3044_v49 = vmul.f32 %v2301_v59, %v2189_v10  ;;  %v63_v37 = vmul.f32 %v2213_v19, %v2187_v9  ;;  %v3092_v31 = vpop.permute.xlu0 %1375  ;;  %v3094_v21 = vpop.permute.xlu1 %1377 }
 0x470   : > { %4150 = vst [vmem:[#allocation152_spill] sm:$0xff] %v3092_v31  ;;  %4151 = vst [vmem:[#allocation153_spill] sm:$0xff] %v3094_v21  ;;  %v153_v31 = vmul.f32 %v2249_v33, %v2294_v56  ;;  %v154_v21 = vmul.f32 %v2249_v33, %v2301_v59  ;;  %v162_v56 = vadd.f32 %v150_v32, %v70_v50 }
 0x471   : > { %v155_v27 = vadd.f32 %v143_v48, %v63_v37  ;;  %v160_v48 = vadd.f32 %v148_v20, %v68_v42 }
 0x473   : > { %1586 = vrot.lane.b32.xlu0 %v1551_v47, %s2117_s25  ;;  %1594 = vrot.lane.b32.xlu1 %v1555_v13, %s2117_s25  ;;  %v64_v47 = vmul.f32 %v2210_v18, %v2187_v9  ;;  %v65_v13 = vmul.f32 %v2231_v26, %v2187_v9  ;;  %v114_v9 = vmul.f32 %v2301_v59, %v2206_v16 }
 0x474   : > { %v217_v18 = vsel %vm215_vm0, %v2367_v51, %v2377_v58 }
 0x475   : > { %v156_v28 = vadd.f32 %v144_v40, %v64_v47  ;;  %v157_v25 = vadd.f32 %v145_v46, %v65_v13  ;;  %v237_v20 = vadd.f32 %v217_v18, %v104_v0  ;;  %v247_v40 = vadd.f32 %v2395_v6, %v114_v9  ;;  %v4155_v0 = vld [vmem:[#allocation8_spill] sm:$0xff]  ;;  %v4159_v47 = vld [vmem:[#allocation11_spill] sm:$0xff] }
 0x477   : > { %1602 = vrot.lane.b32.xlu0 %v1559_v53, %s2117_s25  ;;  %1610 = vrot.lane.b32.xlu1 %v1563_v1, %s2117_s25  ;;  %v108_v53 = vmul.f32 %v2301_v59, %v2198_v12  ;;  %v69_v1 = vmul.f32 %v2213_v19, %v2189_v10  ;;  %v66_v10 = vmul.f32 %v2213_v19, %v2198_v12 }
 0x478   : > { %v152_v12 = vmul.f32 %v2249_v33, %v2291_v55  ;;  %v74_v19 = vmul.f32 %v2231_v26, %v2206_v16  ;;  %v216_v55 = vsel %vm215_vm0, %v2369_v52, %v2367_v51  ;;  %v218_v26 = vsel %vm215_vm0, %v2375_v57, %v2383_v61  ;;  %v3125_v51 = vpop.permute.xlu0 %1379 }
 0x479   : > { %v158_v22 = vadd.f32 %v146_v45, %v66_v10  ;;  %v161_v16 = vadd.f32 %v149_v36, %v69_v1  ;;  %v163_v33 = vadd.f32 %v151_v29, %v71_v3  ;;  %v220_v52 = vsel %vm215_vm0, %v2388_v63, %v2386_v62  ;;  %v3127_v36 = vpop.permute.xlu1 %1381  ;;  %v4153_v3 = vld [vmem:[#allocation7_spill] sm:$0xff]  ;;  %v4162_v1 = vld [vmem:[#allocation14_spill] sm:$0xff]  ;;  %v4163_v10 = vld [vmem:[#allocation16_spill] sm:$0xff] }
 0x47a   : > { %v164_v59 = vadd.f32 %v152_v12, %v72_v34  ;;  %v165_v45 = vadd.f32 %v153_v31, %v73_v24  ;;  %v166_v11 = vadd.f32 %v154_v21, %v74_v19  ;;  %v236_v42 = vadd.f32 %v216_v55, %v103_v41  ;;  %v4154_v41 = vld [vmem:[#allocation9_spill] sm:$0xff]  ;;  %v4164_v19 = vld [vmem:[#allocation18_spill] sm:$0xff] }
 0x47b   : > { %v238_v57 = vadd.f32 %v2377_v58, %v105_v35  ;;  %v221_v29 = vsel %vm215_vm0, %v2386_v62, %v2393_v5  ;;  %v241_v61 = vadd.f32 %v2381_v60, %v108_v53  ;;  %v239_v32 = vadd.f32 %v218_v26, %v106_v54  ;;  %v4160_v53 = vld [vmem:[#allocation13_spill] sm:$0xff] }
 0x47c   : > { %v222_v63 = vsel %vm215_vm0, %v2391_v4, %v2397_v7  ;;  %v223_v31 = vsel %vm215_vm0, %v2397_v7, %v2395_v6  ;;  %v240_v34 = vadd.f32 %v219_v14, %v107_v39  ;;  %v242_v50 = vadd.f32 %v220_v52, %v3032_v43  ;;  %v4152_v7 = vld [vmem:[#allocation6_spill] sm:$0xff]  ;;  %v4165_v55 = vld [vmem:[#allocation17_spill] sm:$0xff]  ;;  %v4168_v52 = vld [vmem:[#allocation20_spill] sm:$0xff] }
 0x47d   : > { %v312_v58 = vsel %vm215_vm0, %v2399_v8, %v2401_v15  ;;  %v313_v60 = vsel %vm215_vm0, %v2401_v15, %v2403_v17  ;;  %v243_v62 = vadd.f32 %v221_v29, %v3036_v44  ;;  %v244_v4 = vadd.f32 %v2393_v5, %v3044_v49  ;;  %v4156_v44 = vld [vmem:[#allocation10_spill] sm:$0xff]  ;;  %v3164_v49 = vpop.permute.xlu0 %1383  ;;  %v4167_v14 = vld [vmem:[#allocation21_spill] sm:$0xff] }
 0x47e   : > { %v314_v39 = vsel %vm215_vm0, %v4152_v7, %v2407_v23  ;;  %v245_v46 = vadd.f32 %v222_v63, %v112_v38  ;;  %v246_v54 = vadd.f32 %v223_v31, %v113_v2  ;;  %v315_v8 = vsel %vm215_vm0, %v2407_v23, %v4153_v3  ;;  %v3166_v38 = vpop.permute.xlu1 %1385  ;;  %v4158_v23 = vld [vmem:[#allocation12_spill] sm:$0xff]  ;;  %v4169_v31 = vld [vmem:[#allocation22_spill] sm:$0xff] }
 0x47f   : > { %v316_v15 = vsel %vm215_vm0, %v4155_v0, %v4154_v41  ;;  %v332_v35 = vadd.f32 %v312_v58, %v155_v27  ;;  %v333_v43 = vadd.f32 %v313_v60, %v156_v28  ;;  %v334_v5 = vadd.f32 %v2403_v17, %v157_v25  ;;  %4157 = vst [vmem:[#allocation6_spill] sm:$0xff] %v3166_v38  ;;  %v4161_v28 = vld [vmem:[#allocation15_spill] sm:$0xff] }
 0x480   : > { %v317_v6 = vsel %vm215_vm0, %v4154_v41, %v4156_v44  ;;  %v335_v2 = vadd.f32 %v314_v39, %v158_v22  ;;  %v337_v37 = vadd.f32 %v4153_v3, %v160_v48  ;;  %v318_v13 = vsel %vm215_vm0, %v4159_v47, %v4158_v23  ;;  %v4171_v60 = vld [vmem:[#allocation23_spill] sm:$0xff]  ;;  %v4172_v39 = vld [vmem:[#allocation25_spill] sm:$0xff]  ;;  %v4173_v41 = vld [vmem:[#allocation26_spill] sm:$0xff] }
 0x481   : > { %v319_v27 = vsel %vm215_vm0, %v4158_v23, %v4160_v53  ;;  %v336_v17 = vadd.f32 %v315_v8, %v159_v30  ;;  %v338_v25 = vadd.f32 %v316_v15, %v161_v16  ;;  %v392_v9 = vsel %vm215_vm0, %v4162_v1, %v4161_v28  ;;  %v4166_v16 = vld [vmem:[#allocation19_spill] sm:$0xff]  ;;  %v3203_v8 = vpop.permute.xlu0 %1387  ;;  %v4175_v15 = vld [vmem:[#allocation29_spill] sm:$0xff]  ;;  %v4179_v1 = vld [vmem:[#allocation32_spill] sm:$0xff] }
 0x482   : > { %v393_v22 = vsel %vm215_vm0, %v4161_v28, %v4163_v10  ;;  %v339_v21 = vadd.f32 %v317_v6, %v162_v56  ;;  %v340_v12 = vadd.f32 %v4156_v44, %v163_v33  ;;  %v343_v24 = vadd.f32 %v4160_v53, %v166_v11  ;;  %v4174_v0 = vld [vmem:[#allocation27_spill] sm:$0xff] }
 0x483   : > { %v394_v18 = vsel %vm215_vm0, %v4165_v55, %v4164_v19  ;;  %v341_v48 = vadd.f32 %v318_v13, %v164_v59  ;;  %v342_v30 = vadd.f32 %v319_v27, %v165_v45  ;;  %v395_v26 = vsel %vm215_vm0, %v4164_v19, %v4166_v16  ;;  %v4170_v45 = vld [vmem:[#allocation24_spill] sm:$0xff]  ;;  %v4176_v47 = vld [vmem:[#allocation31_spill] sm:$0xff] }
 0x484   : > { %v396_v29 = vsel %vm215_vm0, %v4168_v52, %v4167_v14  ;;  %v412_v63 = vadd.f32 %v392_v9, %v236_v42  ;;  %v413_v56 = vadd.f32 %v393_v22, %v237_v20  ;;  %v414_v33 = vadd.f32 %v4163_v10, %v238_v57  ;;  %v3205_v42 = vpop.permute.xlu1 %1389  ;;  %v4177_v13 = vld [vmem:[#allocation28_spill] sm:$0xff]  ;;  %v4180_v9 = vld [vmem:[#allocation33_spill] sm:$0xff]  ;;  %v4181_v19 = vld [vmem:[#allocation35_spill] sm:$0xff] }
 0x485   : > { %v397_v11 = vsel %vm215_vm0, %v4167_v14, %v4169_v31  ;;  %v415_v58 = vadd.f32 %v394_v18, %v239_v32  ;;  %v417_v59 = vadd.f32 %v4166_v16, %v241_v61  ;;  %v398_v7 = vsel %vm215_vm0, %v4171_v60, %v4170_v45  ;;  %v4183_v18 = vld [vmem:[#allocation34_spill] sm:$0xff] }
 0x486   : > { %v399_v3 = vsel %vm215_vm0, %v4170_v45, %v4172_v39  ;;  %v416_v20 = vadd.f32 %v395_v26, %v240_v34  ;;  %v418_v57 = vadd.f32 %v396_v29, %v242_v50  ;;  %v489_v32 = vsel %vm488_vm1, %v4174_v0, %v4173_v41  ;;  %v4178_v50 = vld [vmem:[#allocation30_spill] sm:$0xff]  ;;  %v4184_v26 = vld [vmem:[#allocation36_spill] sm:$0xff]  ;;  %v4186_v29 = vld [vmem:[#allocation39_spill] sm:$0xff] }
 0x487   : > { %v490_v61 = vsel %vm488_vm1, %v4173_v41, %v4175_v15  ;;  %v419_v44 = vadd.f32 %v397_v11, %v243_v62  ;;  %v420_v6 = vadd.f32 %v4169_v31, %v244_v4  ;;  %v423_v23 = vadd.f32 %v4172_v39, %v247_v40  ;;  %v4187_v31 = vld [vmem:[#allocation41_spill] sm:$0xff]  ;;  %v4190_v39 = vld [vmem:[#allocation40_spill] sm:$0xff] }
 0x488   : > { %v491_v53 = vsel %vm488_vm1, %v4177_v13, %v4176_v47  ;;  %v421_v27 = vadd.f32 %v398_v7, %v245_v46  ;;  %v422_v34 = vadd.f32 %v399_v3, %v246_v54  ;;  %v492_v28 = vsel %vm488_vm1, %v4176_v47, %v4178_v50  ;;  %v4182_v54 = vld [vmem:[#allocation37_spill] sm:$0xff]  ;;  %v4189_v7 = vld [vmem:[#allocation43_spill] sm:$0xff] }
 0x489   : > { %v493_v10 = vsel %vm488_vm1, %v4180_v9, %v4179_v1  ;;  %v509_v22 = vadd.f32 %v489_v32, %v332_v35  ;;  %v510_v62 = vadd.f32 %v490_v61, %v333_v43  ;;  %v511_v4 = vadd.f32 %v4175_v15, %v334_v5  ;;  %v4185_v43 = vld [vmem:[#allocation38_spill] sm:$0xff]  ;;  %v4192_v15 = vld [vmem:[#allocation44_spill] sm:$0xff]  ;;  %v4193_v61 = vld [vmem:[#allocation45_spill] sm:$0xff] }
 0x48a   : > { %v494_v40 = vsel %vm488_vm1, %v4179_v1, %v4181_v19  ;;  %v514_v55 = vadd.f32 %v4178_v50, %v337_v37  ;;  %v512_v46 = vadd.f32 %v491_v53, %v335_v2  ;;  %v495_v16 = vsel %vm488_vm1, %v4183_v18, %v4182_v54  ;;  %v3241_v37 = vpop.permute.xlu0 %1391  ;;  %v3243_v2 = vpop.permute.xlu1 %1393  ;;  %v4194_v53 = vld [vmem:[#allocation47_spill] sm:$0xff]  ;;  %v4199_v18 = vld [vmem:[#allocation50_spill] sm:$0xff] }
 0x48b   : > { %v496_v14 = vsel %vm488_vm1, %v4182_v54, %v4184_v26  ;;  %v513_v52 = vadd.f32 %v492_v28, %v336_v17  ;;  %v515_v35 = vadd.f32 %v493_v10, %v338_v25  ;;  %v569_v5 = vsel %vm488_vm1, %v4186_v29, %v4185_v43  ;;  %4188 = vst [vmem:[#allocation7_spill] sm:$0xff] %v3243_v2  ;;  %v4191_v25 = vld [vmem:[#allocation42_spill] sm:$0xff]  ;;  %v4195_v10 = vld [vmem:[#allocation49_spill] sm:$0xff]  ;;  %v4198_v54 = vld [vmem:[#allocation51_spill] sm:$0xff] }
 0x48c   : > { %v570_v11 = vsel %vm488_vm1, %v4185_v43, %v4187_v31  ;;  %v516_v45 = vadd.f32 %v494_v40, %v339_v21  ;;  %v517_v60 = vadd.f32 %v4181_v19, %v340_v12  ;;  %v571_v17 = vsel %vm488_vm1, %v4190_v39, %v4189_v7  ;;  %v4202_v43 = vld [vmem:[#allocation53_spill] sm:$0xff]  ;;  %v4203_v29 = vld [vmem:[#allocation55_spill] sm:$0xff] }
 0x48d   : > { %v572_v3 = vsel %vm488_vm1, %v4189_v7, %v4191_v25  ;;  %v520_v41 = vadd.f32 %v4184_v26, %v343_v24  ;;  %v518_v0 = vadd.f32 %v495_v16, %v341_v48  ;;  %v519_v32 = vadd.f32 %v496_v14, %v342_v30  ;;  %v4196_v24 = vld [vmem:[#allocation46_spill] sm:$0xff]  ;;  %v4200_v16 = vld [vmem:[#allocation52_spill] sm:$0xff] }
 0x48e   : > { %v573_v47 = vsel %vm488_vm1, %v4193_v61, %v4192_v15  ;;  %v589_v13 = vadd.f32 %v569_v5, %v412_v63  ;;  %v590_v21 = vadd.f32 %v570_v11, %v413_v56  ;;  %v591_v12 = vadd.f32 %v4187_v31, %v414_v33  ;;  %v4197_v33 = vld [vmem:[#allocation48_spill] sm:$0xff]  ;;  %v4201_v14 = vld [vmem:[#allocation54_spill] sm:$0xff]  ;;  %v4204_v31 = vld [vmem:[#allocation57_spill] sm:$0xff] }
 0x48f   : > { %v574_v50 = vsel %vm488_vm1, %v4192_v15, %v4194_v53  ;;  %v594_v28 = vadd.f32 %v4191_v25, %v417_v59  ;;  %v592_v1 = vadd.f32 %v571_v17, %v415_v58  ;;  %v593_v9 = vadd.f32 %v572_v3, %v416_v20  ;;  %v4205_v11 = vld [vmem:[#allocation56_spill] sm:$0xff]  ;;  %v4206_v17 = vld [vmem:[#allocation58_spill] sm:$0xff] }
 0x490   : > { %v575_v48 = vsel %vm488_vm1, %v4196_v24, %v4195_v10  ;;  %v595_v63 = vadd.f32 %v573_v47, %v418_v57  ;;  %v597_v56 = vadd.f32 %v4194_v53, %v420_v6  ;;  %v576_v40 = vsel %vm488_vm1, %v4195_v10, %v4197_v33  ;;  %v4208_v53 = vld [vmem:[#allocation60_spill] sm:$0xff]  ;;  %v4210_v24 = vld [vmem:[#allocation61_spill] sm:$0xff] }
 0x491   : > { %v665_v58 = vsel %vm488_vm1, %v4199_v18, %v4198_v54  ;;  %v596_v59 = vadd.f32 %v574_v50, %v419_v44  ;;  %v600_v20 = vadd.f32 %v4197_v33, %v423_v23  ;;  %v666_v26 = vsel %vm488_vm1, %v4198_v54, %v4200_v16  ;;  %v4209_v50 = vld [vmem:[#allocation59_spill] sm:$0xff]  ;;  %v4212_v33 = vld [vmem:[#allocation62_spill] sm:$0xff] }
 0x492   : > { %v667_v57 = vsel %vm488_vm1, %v4202_v43, %v4201_v14  ;;  %v598_v6 = vadd.f32 %v575_v48, %v421_v27  ;;  %v668_v5 = vsel %vm488_vm1, %v4201_v14, %v4203_v29  ;;  %v669_v7 = vsel %vm488_vm1, %v4205_v11, %v4204_v31  ;;  %v4211_v48 = vld [vmem:[#allocation63_spill] sm:$0xff]  ;;  %v4214_v18 = vld [vmem:[#allocation66_spill] sm:$0xff]  ;;  %v4217_v43 = vld [vmem:[#allocation69_spill] sm:$0xff] }
 0x493   : > { %v599_v44 = vadd.f32 %v576_v40, %v422_v34  ;;  %v685_v23 = vadd.f32 %v665_v58, %v509_v22  ;;  %v687_v39 = vadd.f32 %v4200_v16, %v511_v4  ;;  %v670_v25 = vsel %vm488_vm1, %v4204_v31, %v4206_v17  ;;  %v4215_v58 = vld [vmem:[#allocation65_spill] sm:$0xff] }
 0x494   : > { %v686_v15 = vadd.f32 %v666_v26, %v510_v62  ;;  %v688_v61 = vadd.f32 %v667_v57, %v512_v46  ;;  %v690_v47 = vadd.f32 %v4203_v29, %v514_v55  ;;  %v671_v10 = vsel %vm488_vm1, %v4209_v50, %v4208_v53  ;;  %v4213_v46 = vld [vmem:[#allocation64_spill] sm:$0xff]  ;;  %v4216_v26 = vld [vmem:[#allocation67_spill] sm:$0xff] }
 0x495   : > { %v689_v34 = vadd.f32 %v668_v5, %v513_v52  ;;  %v691_v22 = vadd.f32 %v669_v7, %v515_v35  ;;  %v672_v4 = vsel %vm488_vm1, %v4208_v53, %v4210_v24  ;;  %v746_v40 = vsel %vm745_vm2, %v4212_v33, %v4211_v48  ;;  %v4218_v57 = vld [vmem:[#allocation68_spill] sm:$0xff]  ;;  %v4219_v7 = vld [vmem:[#allocation70_spill] sm:$0xff]  ;;  %v4221_v50 = vld [vmem:[#allocation71_spill] sm:$0xff] }
 0x496   : > { %v692_v54 = vadd.f32 %v670_v25, %v516_v45  ;;  %v693_v62 = vadd.f32 %v4206_v17, %v517_v60  ;;  %v747_v55 = vsel %vm745_vm2, %v4211_v48, %v4213_v46  ;;  %v748_v52 = vsel %vm745_vm2, %v4215_v58, %v4214_v18  ;;  %v4220_v53 = vld [vmem:[#allocation72_spill] sm:$0xff]  ;;  %v4222_v33 = vld [vmem:[#allocation73_spill] sm:$0xff] }
 0x497   : > { %v694_v35 = vadd.f32 %v671_v10, %v518_v0  ;;  %v696_v16 = vadd.f32 %v4210_v24, %v520_v41  ;;  %v749_v14 = vsel %vm745_vm2, %v4214_v18, %v4216_v26  ;;  %v750_v45 = vsel %vm745_vm2, %v4218_v57, %v4217_v43  ;;  %v4227_v18 = vld [vmem:[#allocation79_spill] sm:$0xff]  ;;  %v4228_v58 = vld [vmem:[#allocation76_spill] sm:$0xff] }
 0x498   : > { %v695_v5 = vadd.f32 %v672_v4, %v519_v32  ;;  %v766_v31 = vadd.f32 %v746_v40, %v589_v13  ;;  %v768_v11 = vadd.f32 %v4213_v46, %v591_v12  ;;  %v751_v41 = vsel %vm745_vm2, %v4217_v43, %v4219_v7  ;;  %v4223_v13 = vld [vmem:[#allocation74_spill] sm:$0xff]  ;;  %v4224_v12 = vld [vmem:[#allocation75_spill] sm:$0xff] }
 0x499   : > { %v767_v0 = vadd.f32 %v747_v55, %v590_v21  ;;  %v769_v17 = vadd.f32 %v748_v52, %v592_v1  ;;  %v771_v25 = vadd.f32 %v4216_v26, %v594_v28  ;;  %v752_v10 = vsel %vm745_vm2, %v4221_v50, %v4220_v53  ;;  %v4226_v1 = vld [vmem:[#allocation77_spill] sm:$0xff]  ;;  %v4230_v26 = vld [vmem:[#allocation80_spill] sm:$0xff] }
 0x49a   : > { %v770_v24 = vadd.f32 %v749_v14, %v593_v9  ;;  %v772_v48 = vadd.f32 %v750_v45, %v595_v63  ;;  %v753_v32 = vsel %vm745_vm2, %v4220_v53, %v4222_v33  ;;  %v842_v4 = vsel %vm745_vm2, %v4224_v12, %v4223_v13  ;;  %v4235_v50 = vld [vmem:[#allocation84_spill] sm:$0xff] }
 0x49b   : > { %v773_v40 = vadd.f32 %v751_v41, %v596_v59  ;;  %v3339_v21 = vadd.f32 %v4219_v7, %v597_v56  ;;  %v3342_v28 = vadd.f32 %v4222_v33, %v600_v20  ;;  %v843_v9 = vsel %vm745_vm2, %v4223_v13, %v4226_v1  ;;  %v4229_v59 = vld [vmem:[#allocation78_spill] sm:$0xff]  ;;  %v4231_v20 = vld [vmem:[#allocation81_spill] sm:$0xff]  ;;  %v4233_v7 = vld [vmem:[#allocation83_spill] sm:$0xff] }
 0x49c   : > { %v775_v55 = vadd.f32 %v752_v10, %v598_v6  ;;  %v844_v52 = vsel %vm745_vm2, %v4228_v58, %v4227_v18  ;;  %v845_v56 = vsel %vm745_vm2, %v4227_v18, %v4229_v59  ;;  %v846_v14 = vsel %vm745_vm2, %v4231_v20, %v4230_v26  ;;  %v4236_v10 = vld [vmem:[#allocation82_spill] sm:$0xff]  ;;  %v4237_v13 = vld [vmem:[#allocation85_spill] sm:$0xff]  ;;  %v4241_v58 = vld [vmem:[#allocation88_spill] sm:$0xff] }
 0x49d   : > { %4225 = vst [vmem:[#allocation8_spill] sm:$0xff] %v3342_v28  ;;  %v3360_v43 = vadd.f32 %v753_v32, %v599_v44  ;;  %v862_v57 = vadd.f32 %v842_v4, %v685_v23  ;;  %v3363_v45 = vadd.f32 %v4226_v1, %v687_v39  ;;  %v847_v6 = vsel %vm745_vm2, %v4230_v26, %v4233_v7  ;;  %v4239_v1 = vld [vmem:[#allocation87_spill] sm:$0xff]  ;;  %v4273_v28 = vld [vmem:[#allocation122_spill] sm:$0xff] }
 0x49e   : > { %v3368_v41 = vadd.f32 %v843_v9, %v686_v15  ;;  %v3371_v53 = vadd.f32 %v4229_v59, %v690_v47  ;;  %v848_v33 = vsel %vm745_vm2, %v4236_v10, %v4235_v50  ;;  %v849_v44 = vsel %vm745_vm2, %v4235_v50, %v4237_v13  ;;  %v4240_v9 = vld [vmem:[#allocation86_spill] sm:$0xff]  ;;  %v4244_v59 = vld [vmem:[#allocation89_spill] sm:$0xff]  ;;  %v4246_v20 = vld [vmem:[#allocation99_spill] sm:$0xff] }
 0x49f   : > { %4232 = vst [vmem:[#allocation10_spill] sm:$0xff] %v3363_v45  ;;  %v865_v23 = vadd.f32 %v844_v52, %v688_v61  ;;  %v3379_v39 = vadd.f32 %v845_v56, %v689_v34  ;;  %v3381_v32 = vadd.f32 %v846_v14, %v691_v22  ;;  %v3387_v47 = vadd.f32 %v847_v6, %v692_v54  ;;  %v4243_v54 = vld [vmem:[#allocation90_spill] sm:$0xff]  ;;  %v4245_v56 = vld [vmem:[#allocation91_spill] sm:$0xff] }
 0x4a0   : > { %4234 = vst [vmem:[#allocation12_spill] sm:$0xff] %v3371_v53  ;;  %v3390_v4 = vadd.f32 %v4233_v7, %v693_v62  ;;  %v922_v18 = vsel %vm745_vm2, %v4240_v9, %v4239_v1  ;;  %v923_v61 = vsel %vm745_vm2, %v4239_v1, %v4241_v58  ;;  %v3399_v34 = vadd.f32 %v4237_v13, %v696_v16  ;;  %v4247_v14 = vld [vmem:[#allocation98_spill] sm:$0xff]  ;;  %v4248_v6 = vld [vmem:[#allocation115_spill] sm:$0xff]  ;;  %v4252_v13 = vld [vmem:[#allocation92_spill] sm:$0xff] }
 0x4a1   : > { %v3401_v22 = vadd.f32 %v848_v33, %v694_v35  ;;  %v3403_v52 = vadd.f32 %v849_v44, %v695_v5  ;;  %v924_v62 = vsel %vm745_vm2, %v4244_v59, %v4243_v54  ;;  %v925_v26 = vsel %vm745_vm2, %v4243_v54, %v4245_v56  ;;  %v4249_v16 = vld [vmem:[#allocation114_spill] sm:$0xff]  ;;  %v4251_v33 = vld [vmem:[#allocation93_spill] sm:$0xff]  ;;  %v4270_v53 = vld [vmem:[#allocation107_spill] sm:$0xff] }
 0x4a2   : > { %4238 = vst [vmem:[#allocation11_spill] sm:$0xff] %v3390_v4  ;;  %4242 = vst [vmem:[#allocation13_spill] sm:$0xff] %v3399_v34  ;;  %v1058_v7 = vsel %vm1057_vm3, %v4247_v14, %v4246_v20  ;;  %v1179_v35 = vsel %vm1057_vm3, %v4249_v16, %v4248_v6  ;;  %v942_v50 = vadd.f32 %v922_v18, %v766_v31  ;;  %v4254_v59 = vld [vmem:[#allocation94_spill] sm:$0xff]  ;;  %vm1967_vm0 = vcmask 121856  }
 0x4a3   : > { %v3417_v5 = vadd.f32 %v923_v61, %v767_v0  ;;  %v3420_v10 = vadd.f32 %v4241_v58, %v768_v11  ;;  %v926_v44 = vsel %vm745_vm2, %v4252_v13, %v4251_v33  ;;  %v3428_v54 = vadd.f32 %v4245_v56, %v771_v25  ;;  %v4255_v31 = vld [vmem:[#allocation130_spill] sm:$0xff]  ;;  %v4256_v0 = vld [vmem:[#allocation131_spill] sm:$0xff] }
 0x4a4   : > { %v927_v14 = vsel %vm745_vm2, %v4251_v33, %v4254_v59  ;;  %v1295_v18 = vsel %vm1057_vm3, %v4256_v0, %v4255_v31  ;;  %v4257_v11 = vld [vmem:[#allocation147_spill] sm:$0xff]  ;;  %v4258_v58 = vld [vmem:[#allocation146_spill] sm:$0xff]  ;;  %v945_v16 = vadd.f32 %v924_v62, %v769_v17  ;;  %v3439_v13 = vadd.f32 %v925_v26, %v770_v24  ;;  %v4263_v17 = vld [vmem:[#allocation96_spill] sm:$0xff] }
 0x4a5   : > { %4250 = vst [vmem:[#allocation15_spill] sm:$0xff] %v3420_v10  ;;  %4253 = vst [vmem:[#allocation14_spill] sm:$0xff] %v3428_v54  ;;  %v1396_v61 = vsel %vm1395_vm4, %v4258_v58, %v4257_v11  ;;  %v1082_v2 = vadd.f32 %v1058_v7, %v862_v57  ;;  %v1203_v38 = vadd.f32 %v1179_v35, %v942_v50  ;;  %v4259_v25 = vld [vmem:[#allocation103_spill] sm:$0xff]  ;;  %v4260_v56 = vld [vmem:[#allocation102_spill] sm:$0xff] }
 0x4a6   : > { %v1061_v54 = vsel %vm1057_vm3, %v4260_v56, %v4259_v25  ;;  %v4261_v10 = vld [vmem:[#allocation119_spill] sm:$0xff]  ;;  %v4262_v33 = vld [vmem:[#allocation118_spill] sm:$0xff]  ;;  %v3450_v4 = vadd.f32 %v927_v14, %v773_v40  ;;  %v4265_v35 = vld [vmem:[#allocation97_spill] sm:$0xff] }
 0x4a7   : > { %v1182_v34 = vsel %vm1057_vm3, %v4262_v33, %v4261_v10  ;;  %v4264_v24 = vld [vmem:[#allocation95_spill] sm:$0xff]  ;;  %v1319_v62 = vadd.f32 %v1295_v18, %v1082_v2  ;;  %v929_v50 = vsel %vm745_vm2, %v4263_v17, %v4265_v35  ;;  %v4267_v58 = vld [vmem:[#allocation134_spill] sm:$0xff]  ;;  %v1085_v2 = vadd.f32 %v1061_v54, %v865_v23 }
 0x4a8   : > { %v928_v57 = vsel %vm745_vm2, %v4264_v24, %v4263_v17  ;;  %v4269_v40 = vld [vmem:[#allocation150_spill] sm:$0xff]  ;;  %v4272_v35 = vld [vmem:[#allocation123_spill] sm:$0xff]  ;;  %v3478_v59 = vadd.f32 %v929_v50, %v3360_v43  ;;  %vm2013_vm2 = vcmask 334848  }
 0x4a9   : > { %v951_v24 = vadd.f32 %v928_v57, %v775_v55  ;;  %v4271_v45 = vld [vmem:[#allocation106_spill] sm:$0xff] }
 0x4aa   : > { %v1064_v17 = vsel %vm1057_vm3, %v4271_v45, %v4270_v53 }
 0x4ad   : > { %v3264_v30 = vpop.permute.xlu0 %1480  ;;  %v3266_v19 = vpop.permute.xlu1 %1482 }
 0x4ae   : > { %v1512_v0 = vsel %vm1395_vm4, %v3264_v30, %v3266_v19  ;;  %v4268_v30 = vld [vmem:[#allocation151_spill] sm:$0xff] }
 0x4af   : > { %v1399_v14 = vsel %vm1395_vm4, %v4269_v40, %v4268_v30  ;;  %v1536_v18 = vadd.f32 %v1512_v0, %v1319_v62  ;;  %v4275_v0 = vld [vmem:[#allocation139_spill] sm:$0xff]  ;;  %v1088_v62 = vadd.f32 %v1064_v17, %v3381_v32  ;;  %v4282_v32 = vld [vmem:[#allocation104_spill] sm:$0xff] }
 0x4b1   : > { %v3292_v3 = vpop.permute.xlu0 %1484  ;;  %v3294_v27 = vpop.permute.xlu1 %1486 }
 0x4b2   : > { %4207 = vst [vmem:[#allocation9_spill] sm:$0xff] %v3294_v27  ;;  %v948_v27 = vadd.f32 %v926_v44, %v772_v48  ;;  %v1420_v48 = vadd.f32 %v1396_v61, %v1203_v38  ;;  %v4266_v44 = vld [vmem:[#allocation135_spill] sm:$0xff]  ;;  %v1206_v38 = vadd.f32 %v1182_v34, %v945_v16  ;;  %v4274_v16 = vld [vmem:[#allocation100_spill] sm:$0xff] }
 0x4b3   : > { %v1298_v56 = vsel %vm1057_vm3, %v4267_v58, %v4266_v44  ;;  %v1185_v58 = vsel %vm1057_vm3, %v4273_v28, %v4272_v35  ;;  %v1059_v45 = vsel %vm1057_vm3, %v4246_v20, %v4274_v16  ;;  %v4276_v28 = vld [vmem:[#allocation138_spill] sm:$0xff]  ;;  %v4277_v20 = vld [vmem:[#allocation101_spill] sm:$0xff] }
 0x4b4   : > { %v1322_v23 = vadd.f32 %v1298_v56, %v1085_v2  ;;  %v1423_v34 = vadd.f32 %v1399_v14, %v1206_v38  ;;  %v1301_v57 = vsel %vm1057_vm3, %v4276_v28, %v4275_v0  ;;  %v3501_v14 = vsel %vm1057_vm3, %v4274_v16, %v4277_v20  ;;  %v4279_v2 = vld [vmem:[#allocation110_spill] sm:$0xff]  ;;  %v4280_v38 = vld [vmem:[#allocation127_spill] sm:$0xff]  ;;  %v4283_v16 = vld [vmem:[#allocation108_spill] sm:$0xff] }
 0x4b5   : > { %v3320_v60 = vpop.permute.xlu0 %1488  ;;  %v3322_v29 = vpop.permute.xlu1 %1490  ;;  %v1325_v17 = vadd.f32 %v1301_v57, %v1088_v62  ;;  %v1065_v28 = vsel %vm1057_vm3, %v4270_v53, %v4283_v16  ;;  %v4285_v20 = vld [vmem:[#allocation142_spill] sm:$0xff]  ;;  %v1083_v53 = vadd.f32 %v1059_v45, %v3368_v41 }
 0x4b6   : > { %v1515_v40 = vsel %vm1395_vm4, %v3320_v60, %v3322_v29  ;;  %v1402_v60 = vsel %vm1395_vm4, %v3125_v51, %v3127_v36  ;;  %v1089_v45 = vadd.f32 %v1065_v28, %v3387_v47  ;;  %v4290_v47 = vld [vmem:[#allocation120_spill] sm:$0xff] }
 0x4b7   : > { %v1539_v50 = vadd.f32 %v1515_v40, %v1322_v23  ;;  %v4291_v28 = vld [vmem:[#allocation124_spill] sm:$0xff] }
 0x4b9   : > { %v3347_v63 = vpop.permute.xlu0 %1492  ;;  %v3349_v46 = vpop.permute.xlu1 %1496 }
 0x4bd   : > { %v3383_v12 = vpop.permute.xlu0 %1498  ;;  %v3385_v15 = vpop.permute.xlu1 %1504 }
 0x4c1   : > { %v3425_v1 = vpop.permute.xlu0 %1506  ;;  %v1581_v9 = vpop.permute.xlu1 %1580 }
 0x4c5   : > { %v3455_v26 = vpop.permute.xlu0 %1582  ;;  %v1589_v7 = vpop.permute.xlu1 %1588 }
 0x4c6   : > { %v1612_v33 = vsel %vm1395_vm4, %v1581_v9, %v3455_v26 }
 0x4c7   : > { %v1636_v61 = vadd.f32 %v1612_v33, %v1420_v48  ;;  %v1209_v48 = vadd.f32 %v1185_v58, %v948_v27  ;;  %v4278_v33 = vld [vmem:[#allocation111_spill] sm:$0xff]  ;;  %v1518_v27 = vsel %vm1395_vm4, %v3349_v46, %v3383_v12  ;;  %v1405_v46 = vsel %vm1395_vm4, %v3203_v8, %v3205_v42 }
 0x4c8   : > { %v1067_v51 = vsel %vm1057_vm3, %v4279_v2, %v4278_v33  ;;  %v1542_v62 = vadd.f32 %v1518_v27, %v1325_v17  ;;  %v4289_v17 = vld [vmem:[#allocation148_spill] sm:$0xff] }
 0x4c9   : > { %v3480_v9 = vmax.f32 %v1536_v18, %v1636_v61  ;;  %v3482_v55 = vpop.permute.xlu0 %1590  ;;  %v1597_v54 = vpop.permute.xlu1 %1596  ;;  %v4281_v18 = vld [vmem:[#allocation126_spill] sm:$0xff]  ;;  %v1062_v61 = vsel %vm1057_vm3, %v4259_v25, %v4282_v32  ;;  %v1426_v58 = vadd.f32 %v1402_v60, %v1209_v48  ;;  %v1091_v57 = vadd.f32 %v1067_v51, %v3401_v22 }
 0x4ca   : > { %v1615_v43 = vsel %vm1395_vm4, %v1589_v7, %v3482_v55  ;;  %v1188_v7 = vsel %vm1057_vm3, %v4281_v18, %v4280_v38  ;;  %v4287_v18 = vld [vmem:[#allocation116_spill] sm:$0xff]  ;;  %v1521_v22 = vsel %vm1395_vm4, %v3385_v15, %v3425_v1  ;;  %v1397_v15 = vsel %vm1395_vm4, %v4257_v11, %v4289_v17 }
 0x4cb   : > { %v1639_v56 = vadd.f32 %v1615_v43, %v1423_v34  ;;  %1664 = vrot.lane.b32.xlu0 %v3480_v9, %s2110_s22  ;;  %v4284_v43 = vld [vmem:[#allocation143_spill] sm:$0xff]  ;;  %v1212_v60 = vadd.f32 %v1188_v7, %v951_v24  ;;  %v1180_v8 = vsel %vm1057_vm3, %v4248_v6, %v4287_v18  ;;  %v1086_v24 = vadd.f32 %v1062_v61, %v3379_v39 }
 0x4cc   : > { %v1304_v2 = vsel %vm1057_vm3, %v4285_v20, %v4284_v43  ;;  %v1186_v11 = vsel %vm1057_vm3, %v4272_v35, %v4291_v28  ;;  %v4294_v35 = vld [vmem:[#allocation140_spill] sm:$0xff] }
 0x4cd   : > { %v3515_v40 = vmax.f32 %v1539_v50, %v1639_v56  ;;  %v3517_v23 = vpop.permute.xlu0 %1598  ;;  %v1605_v34 = vpop.permute.xlu1 %1604  ;;  %v4286_v50 = vld [vmem:[#allocation112_spill] sm:$0xff]  ;;  %v1429_v51 = vadd.f32 %v1405_v46, %v1212_v60 }
 0x4ce   : > { %v1618_v25 = vsel %vm1395_vm4, %v1597_v54, %v3517_v23  ;;  %v1068_v56 = vsel %vm1057_vm3, %v4278_v33, %v4286_v50  ;;  %v1328_v54 = vadd.f32 %v1304_v2, %v1091_v57  ;;  %v4288_v33 = vld [vmem:[#allocation133_spill] sm:$0xff]  ;;  %v4292_v46 = vld [vmem:[#allocation128_spill] sm:$0xff] }
 0x4cf   : > { %v1642_v48 = vadd.f32 %v1618_v25, %v1426_v58  ;;  %1666 = vrot.lane.b32.xlu1 %v3515_v40, %s2110_s22  ;;  %v1296_v6 = vsel %vm1057_vm3, %v4255_v31, %v4288_v33  ;;  %v1092_v61 = vadd.f32 %v1068_v56, %v3403_v52  ;;  %v1204_v58 = vadd.f32 %v1180_v8, %v3417_v5  ;;  %v4293_v25 = vld [vmem:[#allocation136_spill] sm:$0xff] }
 0x4d0   : > { %v1545_v20 = vadd.f32 %v1521_v22, %v1328_v54  ;;  %v1183_v31 = vsel %vm1057_vm3, %v4261_v10, %v4290_v47  ;;  %v1513_v52 = vsel %vm1395_vm4, %v3266_v19, %v3292_v3  ;;  %v1320_v5 = vadd.f32 %v1296_v6, %v1083_v53  ;;  %v4295_v56 = vld [vmem:[#allocation152_spill] sm:$0xff] }
 0x4d1   : > { %v3544_v7 = vmax.f32 %v1542_v62, %v1642_v48  ;;  %v3546_v27 = vpop.permute.xlu0 %1606  ;;  %v3548_v41 = vpop.permute.xlu1 %1500  ;;  %v1299_v57 = vsel %vm1057_vm3, %v4266_v44, %v4293_v25  ;;  %v1421_v60 = vadd.f32 %v1397_v15, %v1204_v58  ;;  %v1400_v19 = vsel %vm1395_vm4, %v4268_v30, %v4295_v56 }
 0x4d2   : > { %v1621_v39 = vsel %vm1395_vm4, %v1605_v34, %v3546_v27  ;;  %v1189_v34 = vsel %vm1057_vm3, %v4280_v38, %v4292_v46  ;;  %v1302_v38 = vsel %vm1057_vm3, %v4275_v0, %v4294_v35  ;;  %v1403_v53 = vsel %vm1395_vm4, %v3127_v36, %v3164_v49 }
 0x4d3   : > { %v1645_v2 = vadd.f32 %v1621_v39, %v1429_v51  ;;  %1668 = vrot.lane.b32.xlu0 %v3544_v7, %s2110_s22  ;;  %v1207_v8 = vadd.f32 %v1183_v31, %v3439_v13  ;;  %v1210_v22 = vadd.f32 %v1186_v11, %v3450_v4  ;;  %v1537_v54 = vadd.f32 %v1513_v52, %v1320_v5  ;;  %v4298_v52 = vld [vmem:[#allocation8_spill] sm:$0xff] }
 0x4d4   : > { %v1213_v0 = vadd.f32 %v1189_v34, %v3478_v59  ;;  %v1323_v30 = vadd.f32 %v1299_v57, %v1086_v24  ;;  %v1516_v36 = vsel %vm1395_vm4, %v3322_v29, %v3347_v63  ;;  %v1326_v6 = vadd.f32 %v1302_v38, %v1089_v45  ;;  %v4300_v57 = vld [vmem:[#allocation105_spill] sm:$0xff] }
 0x4d5   : > { %v3578_v62 = vmax.f32 %v1545_v20, %v1645_v2  ;;  %v3580_v10 = vpop.permute.xlu0 %1508  ;;  %v3582_v48 = vpop.permute.xlu1 %1584  ;;  %v1424_v13 = vadd.f32 %v1400_v19, %v1207_v8  ;;  %v1427_v15 = vadd.f32 %v1403_v53, %v1210_v22  ;;  %v4296_v20 = vld [vmem:[#allocation144_spill] sm:$0xff]  ;;  %v1406_v29 = vsel %vm1395_vm4, %v3205_v42, %v3241_v37  ;;  %v4299_v42 = vld [vmem:[#allocation97_spill] sm:$0xff] }
 0x4d6   : > { %v1613_v44 = vsel %vm1395_vm4, %v3455_v26, %v3582_v48  ;;  %v1519_v26 = vsel %vm1395_vm4, %v3383_v12, %v3548_v41  ;;  %v1305_v59 = vsel %vm1057_vm3, %v4284_v43, %v4296_v20  ;;  %v1540_v45 = vadd.f32 %v1516_v36, %v1323_v30  ;;  %v4297_v43 = vld [vmem:[#allocation94_spill] sm:$0xff] }
 0x4d7   : > { %v1637_v51 = vadd.f32 %v1613_v44, %v1421_v60  ;;  %1670 = vrot.lane.b32.xlu1 %v3578_v62, %s2110_s22  ;;  %v1543_v2 = vadd.f32 %v1519_v26, %v1326_v6  ;;  %v950_v34 = vadd.f32 %v4297_v43, %v3339_v21  ;;  %v953_v5 = vadd.f32 %v4299_v42, %v4298_v52  ;;  %v4301_v21 = vld [vmem:[#allocation10_spill] sm:$0xff]  ;;  %v4306_v6 = vld [vmem:[#allocation121_spill] sm:$0xff]  ;;  %v4313_v52 = vld [vmem:[#allocation15_spill] sm:$0xff] }
 0x4d8   : > { %v1329_v60 = vadd.f32 %v1305_v59, %v1092_v61  ;;  %v1430_v38 = vadd.f32 %v1406_v29, %v1213_v0  ;;  %v1084_v22 = vadd.f32 %v3501_v14, %v4301_v21  ;;  %v4304_v61 = vld [vmem:[#allocation117_spill] sm:$0xff]  ;;  %v4305_v14 = vld [vmem:[#allocation12_spill] sm:$0xff]  ;;  %v4309_v59 = vld [vmem:[#allocation11_spill] sm:$0xff] }
 0x4d9   : > { %v3607_v4 = vmax.f32 %v1537_v54, %v1637_v51  ;;  %v3609_v39 = vpop.permute.xlu0 %1592  ;;  %v3611_v58 = vpop.permute.xlu1 %1600  ;;  %v4302_v54 = vld [vmem:[#allocation109_spill] sm:$0xff]  ;;  %v1181_v0 = vsel %vm1057_vm3, %v4287_v18, %v4304_v61 }
 0x4da   : > { %v1616_v12 = vsel %vm1395_vm4, %v3482_v55, %v3609_v39  ;;  %v1619_v24 = vsel %vm1395_vm4, %v3517_v23, %v3611_v58  ;;  %v1063_v55 = vsel %vm1057_vm3, %v4282_v32, %v4300_v57  ;;  %v1522_v23 = vsel %vm1395_vm4, %v3425_v1, %v3580_v10  ;;  %v4303_v32 = vld [vmem:[#allocation113_spill] sm:$0xff] }
 0x4db   : > { %v1640_v31 = vadd.f32 %v1616_v12, %v1424_v13  ;;  %v1643_v11 = vadd.f32 %v1619_v24, %v1427_v15  ;;  %1684 = vrot.lane.b32.xlu0 %v3607_v4, %s2110_s22  ;;  %v1066_v51 = vsel %vm1057_vm3, %v4283_v16, %v4302_v54  ;;  %v1069_v30 = vsel %vm1057_vm3, %v4286_v50, %v4303_v32  ;;  %v4307_v13 = vld [vmem:[#allocation125_spill] sm:$0xff]  ;;  %v4310_v12 = vld [vmem:[#allocation132_spill] sm:$0xff] }
 0x4dc   : > { %v1546_v36 = vadd.f32 %v1522_v23, %v1329_v60  ;;  %v1087_v16 = vadd.f32 %v1063_v55, %v4305_v14  ;;  %v1184_v50 = vsel %vm1057_vm3, %v4290_v47, %v4306_v6  ;;  %v4308_v15 = vld [vmem:[#allocation129_spill] sm:$0xff]  ;;  %v1090_v29 = vadd.f32 %v1066_v51, %v4309_v59  ;;  %v4316_v23 = vld [vmem:[#allocation14_spill] sm:$0xff] }
 0x4dd   : > { %v3637_v19 = vmax.f32 %v1540_v45, %v1640_v31  ;;  %v3639_v53 = vmax.f32 %v1543_v2, %v1643_v11  ;;  %v1609_v44 = vpop.permute.xlu0 %1608  ;;  %v1495_v8 = vpop.permute.xlu1 %1494  ;;  %v1190_v18 = vsel %vm1057_vm3, %v4292_v46, %v4308_v15  ;;  %v1297_v24 = vsel %vm1057_vm3, %v4288_v33, %v4310_v12  ;;  %v4311_v45 = vld [vmem:[#allocation137_spill] sm:$0xff] }
 0x4de   : > { %v1622_v1 = vsel %vm1395_vm4, %v3546_v27, %v1609_v44  ;;  %v1187_v27 = vsel %vm1057_vm3, %v4291_v28, %v4307_v13  ;;  %v1300_v2 = vsel %vm1057_vm3, %v4293_v25, %v4311_v45  ;;  %v4312_v43 = vld [vmem:[#allocation13_spill] sm:$0xff]  ;;  %v1205_v42 = vadd.f32 %v1181_v0, %v4313_v52  ;;  %v4320_v0 = vld [vmem:[#allocation6_spill] sm:$0xff] }
 0x4df   : > { %v1646_v26 = vadd.f32 %v1622_v1, %v1430_v38  ;;  %1686 = vrot.lane.b32.xlu1 %v3637_v19, %s2110_s22  ;;  %1688 = vrot.lane.b32.xlu0 %v3639_v53, %s2110_s22  ;;  %v1093_v28 = vadd.f32 %v1069_v30, %v4312_v43  ;;  %v4314_v57 = vld [vmem:[#allocation149_spill] sm:$0xff]  ;;  %v1208_v60 = vadd.f32 %v1184_v50, %v4316_v23 }
 0x4e0   : > { %v1398_v46 = vsel %vm1395_vm4, %v4289_v17, %v4314_v57  ;;  %v4315_v55 = vld [vmem:[#allocation153_spill] sm:$0xff]  ;;  %v1211_v38 = vadd.f32 %v1187_v27, %v950_v34  ;;  %v1214_v25 = vadd.f32 %v1190_v18, %v953_v5  ;;  %v1321_v51 = vadd.f32 %v1297_v24, %v1084_v22 }
 0x4e1   : > { %v3675_v31 = vmax.f32 %v1546_v36, %v1646_v26  ;;  %v1503_v47 = vpop.permute.xlu0 %1502  ;;  %v1511_v11 = vpop.permute.xlu1 %1510  ;;  %v1401_v33 = vsel %vm1395_vm4, %v4295_v56, %v4315_v55  ;;  %v4317_v21 = vld [vmem:[#allocation9_spill] sm:$0xff]  ;;  %v1324_v32 = vadd.f32 %v1300_v2, %v1087_v16  ;;  %v1517_v56 = vsel %vm1395_vm4, %v3347_v63, %v1495_v8  ;;  %v4321_v26 = vld [vmem:[#allocation7_spill] sm:$0xff] }
 0x4e2   : > { %v1514_v54 = vsel %vm1395_vm4, %v3292_v3, %v4317_v21  ;;  %v4318_v30 = vld [vmem:[#allocation141_spill] sm:$0xff]  ;;  %v1422_v5 = vadd.f32 %v1398_v46, %v1205_v42  ;;  %v1425_v61 = vadd.f32 %v1401_v33, %v1208_v60  ;;  %v1404_v3 = vsel %vm1395_vm4, %v3164_v49, %v4320_v0 }
 0x4e3   : > { %1690 = vrot.lane.b32.xlu1 %v3675_v31, %s2110_s22  ;;  %v1303_v17 = vsel %vm1057_vm3, %v4294_v35, %v4318_v30  ;;  %v4319_v1 = vld [vmem:[#allocation145_spill] sm:$0xff]  ;;  %v1407_v14 = vsel %vm1395_vm4, %v3241_v37, %v4321_v26  ;;  %v1538_v35 = vadd.f32 %v1514_v54, %v1321_v51  ;;  %v1520_v16 = vsel %vm1395_vm4, %v3548_v41, %v1503_v47 }
 0x4e4   : > { %v1306_v34 = vsel %vm1057_vm3, %v4296_v20, %v4319_v1  ;;  %v1541_v20 = vadd.f32 %v1517_v56, %v1324_v32  ;;  %v1327_v49 = vadd.f32 %v1303_v17, %v1090_v29  ;;  %v1523_v27 = vsel %vm1395_vm4, %v3580_v10, %v1511_v11 }
 0x4e5   : > { %v1587_v36 = vpop.permute.xlu0 %1586  ;;  %v1595_v22 = vpop.permute.xlu1 %1594  ;;  %v1330_v13 = vadd.f32 %v1306_v34, %v1093_v28  ;;  %v1428_v15 = vadd.f32 %v1404_v3, %v1211_v38  ;;  %v1431_v37 = vadd.f32 %v1407_v14, %v1214_v25 }
 0x4e6   : > { %v1614_v63 = vsel %vm1395_vm4, %v3582_v48, %v1587_v36  ;;  %v1617_v8 = vsel %vm1395_vm4, %v3609_v39, %v1595_v22  ;;  %v1544_v39 = vadd.f32 %v1520_v16, %v1327_v49  ;;  %v4325_v36 = vld [vmem:[#allocation5_spill] sm:$0xff] }
 0x4e7   : > { %v1638_v6 = vadd.f32 %v1614_v63, %v1422_v5  ;;  %v1641_v50 = vadd.f32 %v1617_v8, %v1425_v61  ;;  %v1547_v45 = vadd.f32 %v1523_v27, %v1330_v13  ;;  %v4324_v5 = vld [vmem:[#allocation4_spill] sm:$0xff] }
 0x4e9   : > { %v3713_v18 = vmax.f32 %v1538_v35, %v1638_v6  ;;  %v3715_v59 = vmax.f32 %v1541_v20, %v1641_v50  ;;  %v1603_v48 = vpop.permute.xlu0 %1602  ;;  %v1611_v12 = vpop.permute.xlu1 %1610 }
 0x4ea   : > { %v1620_v24 = vsel %vm1395_vm4, %v3611_v58, %v1603_v48  ;;  %v1623_v41 = vsel %vm1395_vm4, %v1609_v44, %v1611_v12  ;;  %v2118_v58 = vmov 9  }
 0x4eb   : > { %v1644_v29 = vadd.f32 %v1620_v24, %v1428_v15  ;;  %v1647_v2 = vadd.f32 %v1623_v41, %v1431_v37  ;;  %1718 = vrot.lane.b32.xlu1 %v3715_v59, %s2110_s22  ;;  %1716 = vrot.lane.b32.xlu0 %v3713_v18, %s2110_s22 }
 0x4ec   : > { %2095 = vset.pattern.permute.xlu0 %v2118_v58  ;;  %2094 = vset.pattern.permute.xlu1 %v2118_v58 }
 0x4ed   : > { %v3724_v10 = vmax.f32 %v1544_v39, %v1644_v29  ;;  %v3726_v47 = vmax.f32 %v1547_v45, %v1647_v2 }
 0x4ef   : > { %1722 = vrot.lane.b32.xlu1 %v3726_v47, %s2110_s22  ;;  %1720 = vrot.lane.b32.xlu0 %v3724_v10, %s2110_s22 }
 0x53d   : > { %v1665_v44 = vpop.permute.xlu0 %1664 }
 0x53e   : > { %v3733_v11 = vmax.f32 %v3480_v9, %v1665_v44 }
 0x540   : > { %1740 = vrot.lane.b32.xlu0 %v3733_v11, %s2112_s23 }
 0x541   : > { %v1667_v43 = vpop.permute.xlu1 %1666 }
 0x542   : > { %v3738_v28 = vmax.f32 %v3515_v40, %v1667_v43 }
 0x544   : > { %1742 = vrot.lane.b32.xlu1 %v3738_v28, %s2112_s23 }
 0x545   : > { %v1669_v52 = vpop.permute.xlu0 %1668 }
 0x546   : > { %v3743_v42 = vmax.f32 %v3544_v7, %v1669_v52 }
 0x548   : > { %1744 = vrot.lane.b32.xlu0 %v3743_v42, %s2112_s23 }
 0x549   : > { %v1671_v57 = vpop.permute.xlu1 %1670 }
 0x54a   : > { %v3748_v46 = vmax.f32 %v3578_v62, %v1671_v57 }
 0x54c   : > { %1746 = vrot.lane.b32.xlu1 %v3748_v46, %s2112_s23  ;;  %1752 = vrot.lane.b32.xlu0 %v3733_v11, %s2119_s26 }
 0x54d   : > { %v1685_v55 = vpop.permute.xlu0 %1684 }
 0x54e   : > { %v1692_v23 = vsel %vm488_vm1, %v1665_v44, %v1685_v55  ;;  %v1708_v17 = vmax.f32 %v3607_v4, %v1685_v55 }
 0x54f   : > { %v1700_v38 = vmax.f32 %v3480_v9, %v1692_v23 }
 0x550   : > { %1754 = vrot.lane.b32.xlu1 %v3738_v28, %s2119_s26  ;;  %1756 = vrot.lane.b32.xlu0 %v3743_v42, %s2119_s26 }
 0x551   : > { %v1687_v33 = vpop.permute.xlu1 %1686  ;;  %v1689_v60 = vpop.permute.xlu0 %1688 }
 0x552   : > { %v1693_v25 = vsel %vm488_vm1, %v1667_v43, %v1687_v33  ;;  %v1694_v21 = vsel %vm488_vm1, %v1669_v52, %v1689_v60  ;;  %v1709_v56 = vmax.f32 %v3637_v19, %v1687_v33  ;;  %v1710_v1 = vmax.f32 %v3639_v53, %v1689_v60 }
 0x553   : > { %v1701_v51 = vmax.f32 %v3515_v40, %v1693_v25  ;;  %v1702_v32 = vmax.f32 %v3544_v7, %v1694_v21  ;;  %v4322_v7 = vld [vmem:[#allocation2_spill] sm:$0xff] }
 0x554   : > { %1758 = vrot.lane.b32.xlu1 %v3748_v46, %s2119_s26  ;;  %1764 = vrot.lane.b32.xlu0 %v3733_v11, %s2120_s27 }
 0x555   : > { %v1691_v54 = vpop.permute.xlu1 %1690 }
 0x556   : > { %v1695_v30 = vsel %vm488_vm1, %v1671_v57, %v1691_v54  ;;  %v1711_v40 = vmax.f32 %v3675_v31, %v1691_v54  ;;  %vm1972_vm1 = vcmask 228352  }
 0x557   : > { %v1703_v9 = vmax.f32 %v3578_v62, %v1695_v30  ;;  %v4323_v62 = vld [vmem:[#allocation3_spill] sm:$0xff] }
 0x558   : > { %1766 = vrot.lane.b32.xlu1 %v3738_v28, %s2120_s27  ;;  %1768 = vrot.lane.b32.xlu0 %v3743_v42, %s2120_s27 }
 0x55c   : > { %1770 = vrot.lane.b32.xlu1 %v3748_v46, %s2120_s27  ;;  %1780 = vrot.lane.b32.xlu0 %v1700_v38, %s2121_s28 }
 0x55d   : > { %v1719_v34 = vpop.permute.xlu1 %1718  ;;  %v1717_v61 = vpop.permute.xlu0 %1716 }
 0x55e   : > { %v1731_v0 = vmax.f32 %v3715_v59, %v1719_v34  ;;  %v1729_v22 = vmax.f32 %v3713_v18, %v1717_v61  ;;  %v1730_v63 = vmax.f32 %v3637_v19, %v1719_v34  ;;  %v1728_v8 = vmax.f32 %v3607_v4, %v1717_v61 }
 0x560   : > { %1782 = vrot.lane.b32.xlu1 %v1701_v51, %s2121_s28  ;;  %1784 = vrot.lane.b32.xlu0 %v1702_v32, %s2121_s28 }
 0x561   : > { %v1723_v3 = vpop.permute.xlu1 %1722  ;;  %v1721_v14 = vpop.permute.xlu0 %1720 }
 0x562   : > { %v1735_v26 = vmax.f32 %v3726_v47, %v1723_v3  ;;  %v1733_v35 = vmax.f32 %v3724_v10, %v1721_v14  ;;  %v1734_v20 = vmax.f32 %v3675_v31, %v1723_v3  ;;  %v1732_v16 = vmax.f32 %v3639_v53, %v1721_v14 }
 0x564   : > { %1786 = vrot.lane.b32.xlu1 %v1703_v9, %s2121_s28  ;;  %1796 = vrot.lane.b32.xlu0 %v1708_v17, %s2122_s29 }
 0x568   : > { %1798 = vrot.lane.b32.xlu1 %v1709_v56, %s2122_s29  ;;  %1800 = vrot.lane.b32.xlu0 %v1710_v1, %s2122_s29 }
 0x56c   : > { %1802 = vrot.lane.b32.xlu1 %v1711_v40, %s2122_s29  ;;  %1808 = vrot.lane.b32.xlu0 %v1708_v17, %s2123_s30 }
 0x570   : > { %1810 = vrot.lane.b32.xlu1 %v1709_v56, %s2123_s30  ;;  %1812 = vrot.lane.b32.xlu0 %v1710_v1, %s2123_s30 }
 0x574   : > { %1814 = vrot.lane.b32.xlu1 %v1711_v40, %s2123_s30  ;;  %1820 = vrot.lane.b32.xlu0 %v1708_v17, %s2124_s3 }
 0x578   : > { %1822 = vrot.lane.b32.xlu1 %v1709_v56, %s2124_s3  ;;  %1824 = vrot.lane.b32.xlu0 %v1710_v1, %s2124_s3 }
 0x57c   : > { %1978 = vperm.xlu1 %2094, %v4322_v7   ;;  %1982 = vperm.xlu0 %2095, %v4323_v62  }
 0x580   : > { %1986 = vperm.xlu1 %2094, %v4324_v5   ;;  %1826 = vrot.lane.b32.xlu0 %v1711_v40, %s2124_s3 }
 0x584   : > { %1990 = vperm.xlu1 %2094, %v4325_v36   ;;  %1858 = vrot.lane.b32.xlu0 %v1731_v0, %s2125_s4 }
 0x588   : > { %1866 = vrot.lane.b32.xlu0 %v1735_v26, %s2125_s4  ;;  %1854 = vrot.lane.b32.xlu1 %v1729_v22, %s2125_s4 }
 0x58c   : > { %1883 = vrot.lane.b32.xlu0 %v1731_v0, %s2126_s5  ;;  %1862 = vrot.lane.b32.xlu1 %v1733_v35, %s2125_s4 }
 0x590   : > { %1887 = vrot.lane.b32.xlu0 %v1735_v26, %s2126_s5  ;;  %1881 = vrot.lane.b32.xlu1 %v1729_v22, %s2126_s5 }
 0x594   : > { %1834 = vrot.lane.b32.xlu0 %v1709_v56, %s2127_s6  ;;  %1885 = vrot.lane.b32.xlu1 %v1733_v35, %s2126_s5 }
 0x598   : > { %1838 = vrot.lane.b32.xlu0 %v1711_v40, %s2127_s6  ;;  %1832 = vrot.lane.b32.xlu1 %v1708_v17, %s2127_s6 }
 0x59c   : > { %1856 = vrot.lane.b32.xlu0 %v1730_v63, %s2125_s4  ;;  %1836 = vrot.lane.b32.xlu1 %v1710_v1, %s2127_s6 }
 0x5a0   : > { %1864 = vrot.lane.b32.xlu0 %v1734_v20, %s2125_s4  ;;  %1852 = vrot.lane.b32.xlu1 %v1728_v8, %s2125_s4 }
 0x5a4   : > { %1895 = vrot.lane.b32.xlu0 %v1731_v0, %s2128_s7  ;;  %1860 = vrot.lane.b32.xlu1 %v1732_v16, %s2125_s4 }
 0x5a8   : > { %1899 = vrot.lane.b32.xlu0 %v1735_v26, %s2128_s7  ;;  %1893 = vrot.lane.b32.xlu1 %v1729_v22, %s2128_s7 }
 0x5ac   : > { %1907 = vrot.lane.b32.xlu0 %v1731_v0, %s2129_s8  ;;  %1897 = vrot.lane.b32.xlu1 %v1733_v35, %s2128_s7 }
 0x5b0   : > { %1911 = vrot.lane.b32.xlu0 %v1735_v26, %s2129_s8  ;;  %1905 = vrot.lane.b32.xlu1 %v1729_v22, %s2129_s8 }
 0x5b2   : > { %v1741_v19 = vpop.permute.xlu0 %1740 }
 0x5b3   : > { %v1918_v31 = vsel %vm1917_vm5, %v3733_v11, %v1741_v19 }
 0x5b4   : > { %1909 = vrot.lane.b32.xlu1 %v1733_v35, %s2129_s8 }
 0x5b6   : > { %v1743_v6 = vpop.permute.xlu1 %1742 }
 0x5b7   : > { %v1919_v13 = vsel %vm1917_vm5, %v3738_v28, %v1743_v6 }
 0x5ba   : > { %v1745_v4 = vpop.permute.xlu0 %1744 }
 0x5bb   : > { %v1920_v27 = vsel %vm1917_vm5, %v3743_v42, %v1745_v4 }
 0x5be   : > { %v1747_v50 = vpop.permute.xlu1 %1746  ;;  %v1753_v53 = vpop.permute.xlu0 %1752 }
 0x5bf   : > { %v1923_v49 = vsel %vm1922_vm6, %v1918_v31, %v1753_v53  ;;  %v1921_v48 = vsel %vm1917_vm5, %v3748_v46, %v1747_v50 }
 0x5c2   : > { %v1755_v15 = vpop.permute.xlu1 %1754  ;;  %v1757_v37 = vpop.permute.xlu0 %1756 }
 0x5c3   : > { %v1924_v18 = vsel %vm1922_vm6, %v1919_v13, %v1755_v15  ;;  %v1925_v59 = vsel %vm1922_vm6, %v1920_v27, %v1757_v37 }
 0x5c6   : > { %v1759_v12 = vpop.permute.xlu1 %1758  ;;  %v1765_v39 = vpop.permute.xlu0 %1764 }
 0x5c7   : > { %v1926_v24 = vsel %vm1922_vm6, %v1921_v48, %v1759_v12  ;;  %v1928_v41 = vsel %vm1927_vm7, %v1923_v49, %v1765_v39 }
 0x5ca   : > { %v1767_v45 = vpop.permute.xlu1 %1766  ;;  %v1769_v29 = vpop.permute.xlu0 %1768 }
 0x5cb   : > { %v1930_v2 = vsel %vm1927_vm7, %v1925_v59, %v1769_v29  ;;  %v1929_v0 = vsel %vm1927_vm7, %v1924_v18, %v1767_v45 }
 0x5ce   : > { %v1771_v10 = vpop.permute.xlu1 %1770  ;;  %v1781_v47 = vpop.permute.xlu0 %1780 }
 0x5cf   : > { %v1933_v58 = vsel %vm1932_vm8, %v1928_v41, %v1781_v47  ;;  %v1931_v35 = vsel %vm1927_vm7, %v1926_v24, %v1771_v10 }
 0x5d2   : > { %v1783_v44 = vpop.permute.xlu1 %1782  ;;  %v1785_v11 = vpop.permute.xlu0 %1784 }
 0x5d3   : > { %v3792_v43 = vsel %vm1932_vm8, %v1930_v2, %v1785_v11  ;;  %v1934_v22 = vsel %vm1932_vm8, %v1929_v0, %v1783_v44 }
 0x5d6   : > { %v1787_v28 = vpop.permute.xlu1 %1786  ;;  %v1797_v52 = vpop.permute.xlu0 %1796 }
 0x5d7   : > { %v1936_v16 = vsel %vm1932_vm8, %v1931_v35, %v1787_v28  ;;  %v1938_v19 = vsel %vm1937_vm9, %v1933_v58, %v1797_v52 }
 0x5da   : > { %v1799_v42 = vpop.permute.xlu1 %1798  ;;  %v1801_v57 = vpop.permute.xlu0 %1800 }
 0x5db   : > { %v1939_v26 = vsel %vm1937_vm9, %v1934_v22, %v1799_v42  ;;  %v1940_v41 = vsel %vm1937_vm9, %v3792_v43, %v1801_v57 }
 0x5de   : > { %v1803_v46 = vpop.permute.xlu1 %1802  ;;  %v1809_v55 = vpop.permute.xlu0 %1808 }
 0x5df   : > { %v1941_v31 = vsel %vm1937_vm9, %v1936_v16, %v1803_v46  ;;  %v1943_v50 = vsel %vm1942_vm10, %v1938_v19, %v1809_v55 }
 0x5e2   : > { %v1811_v33 = vpop.permute.xlu1 %1810  ;;  %v1813_v23 = vpop.permute.xlu0 %1812 }
 0x5e3   : > { %v1944_v14 = vsel %vm1942_vm10, %v1939_v26, %v1811_v33  ;;  %v1945_v2 = vsel %vm1942_vm10, %v1940_v41, %v1813_v23 }
 0x5e6   : > { %v1815_v60 = vpop.permute.xlu1 %1814  ;;  %v1821_v38 = vpop.permute.xlu0 %1820 }
 0x5e7   : > { %v1946_v49 = vsel %vm1942_vm10, %v1941_v31, %v1815_v60  ;;  %v1948_v13 = vsel %vm1947_vm13, %v1943_v50, %v1821_v38 }
 0x5ea   : > { %v1823_v25 = vpop.permute.xlu1 %1822  ;;  %v1825_v21 = vpop.permute.xlu0 %1824 }
 0x5eb   : > { %v1949_v63 = vsel %vm1947_vm13, %v1944_v14, %v1823_v25  ;;  %v1950_v58 = vsel %vm1947_vm13, %v1945_v2, %v1825_v21 }
 0x5f7   : > { %v3794_v54 = vpop.permute.xlu1 %1978  ;;  %v3796_v51 = vpop.permute.xlu0 %1982 }
 0x5fb   : > { %v3798_v32 = vpop.permute.xlu1 %1986  ;;  %v1827_v30 = vpop.permute.xlu0 %1826 }
 0x5fc   : > { %v1951_v15 = vsel %vm1947_vm13, %v1946_v49, %v1827_v30 }
 0x5ff   : > { %v3800_v17 = vpop.permute.xlu1 %1990  ;;  %v3802_v9 = vpop.permute.xlu0 %1858 }
 0x603   : > { %v3804_v56 = vpop.permute.xlu1 %1854  ;;  %v3806_v1 = vpop.permute.xlu0 %1866 }
 0x607   : > { %v3808_v40 = vpop.permute.xlu1 %1862  ;;  %v3810_v7 = vpop.permute.xlu0 %1883 }
 0x608   : > { %v1964_v60 = vsel %vm1962_vm15, %v3802_v9, %v3810_v7 }
 0x60b   : > { %v3812_v62 = vpop.permute.xlu1 %1881  ;;  %v3814_v34 = vpop.permute.xlu0 %1887 }
 0x60c   : > { %v1963_v0 = vsel %vm1962_vm15, %v3804_v56, %v3812_v62 }
 0x60f   : > { %v3816_v5 = vpop.permute.xlu1 %1885  ;;  %v1835_v61 = vpop.permute.xlu0 %1834 }
 0x610   : > { %v1954_v6 = vsel %vm1952_vm11, %v1949_v63, %v1835_v61  ;;  %v1965_v62 = vsel %vm1962_vm15, %v3808_v40, %v3816_v5 }
 0x613   : > { %v1833_v3 = vpop.permute.xlu1 %1832  ;;  %v1839_v36 = vpop.permute.xlu0 %1838 }
 0x614   : > { %v1953_v37 = vsel %vm1952_vm11, %v1948_v13, %v1833_v3  ;;  %v1956_v48 = vsel %vm1952_vm11, %v1951_v15, %v1839_v36  ;;  %v1966_v3 = vsel %vm1962_vm15, %v3806_v1, %v3814_v34 }
 0x617   : > { %v1837_v8 = vpop.permute.xlu1 %1836  ;;  %v1857_v20 = vpop.permute.xlu0 %1856 }
 0x618   : > { %v1870_v4 = vsel %vm1868_vm12, %v1857_v20, %v3802_v9  ;;  %v1955_v28 = vsel %vm1952_vm11, %v1950_v58, %v1837_v8 }
 0x619   : > { %v1959_v53 = vsel %vm1957_vm14, %v1954_v6, %v1870_v4 }
 0x61a   : > { %v1995_v27 = vadd.f32 %v3796_v51, %v1959_v53 }
 0x61b   : > { %v1853_v18 = vpop.permute.xlu1 %1852  ;;  %v1865_v59 = vpop.permute.xlu0 %1864 }
 0x61c   : > { %v2003_v12 = vmax.f32 %v1995_v27, 0.0  ;;  %v1869_v39 = vsel %vm1868_vm12, %v1853_v18, %v3804_v56  ;;  %v1872_v24 = vsel %vm1868_vm12, %v1865_v59, %v3806_v1 }
 0x61d   : > { %v1958_v45 = vsel %vm1957_vm14, %v1953_v37, %v1869_v39  ;;  %v1961_v29 = vsel %vm1957_vm14, %v1956_v48, %v1872_v24 }
 0x61e   : > { %2015 = vst [vmem:[%s3841_s12 + $0x10] sm:$0xff] %v2003_v12  ;;  %v1993_v10 = vadd.f32 %v3794_v54, %v1958_v45  ;;  %v1999_v47 = vadd.f32 %v3800_v17, %v1961_v29 }
 0x61f   : > { %v1861_v44 = vpop.permute.xlu1 %1860  ;;  %v1896_v11 = vpop.permute.xlu0 %1895 }
 0x620   : > { %v2001_v43 = vmax.f32 %v1993_v10, 0.0  ;;  %v2007_v52 = vmax.f32 %v1999_v47, 0.0  ;;  %v1871_v42 = vsel %vm1868_vm12, %v1861_v44, %v3808_v40  ;;  %v1969_v38 = vsel %vm1967_vm0, %v1964_v60, %v1896_v11 }
 0x621   : > { %v1960_v57 = vsel %vm1957_vm14, %v1955_v28, %v1871_v42 }
 0x622   : > { %2012 = vst [vmem:[%s3841_s12] sm:$0xff] %v2001_v43  ;;  %2019 = vst [vmem:[%s3841_s12 + $0x30] sm:$0xff] %v2007_v52  ;;  %v1997_v46 = vadd.f32 %v3798_v32, %v1960_v57 }
 0x623   : > { %v1894_v55 = vpop.permute.xlu1 %1893  ;;  %v1900_v33 = vpop.permute.xlu0 %1899 }
 0x624   : > { %v2005_v23 = vmax.f32 %v1997_v46, 0.0  ;;  %v1968_v9 = vsel %vm1967_vm0, %v1963_v0, %v1894_v55  ;;  %v1971_v7 = vsel %vm1967_vm0, %v1966_v3, %v1900_v33 }
 0x626   : > { %2017 = vst [vmem:[%s3841_s12 + $0x20] sm:$0xff] %v2005_v23 }
 0x627   : > { %v1898_v25 = vpop.permute.xlu1 %1897  ;;  %v1908_v21 = vpop.permute.xlu0 %1907 }
 0x628   : > { %v1974_v30 = vsel %vm1972_vm1, %v1969_v38, %v1908_v21  ;;  %v1970_v34 = vsel %vm1967_vm0, %v1965_v62, %v1898_v25 }
 0x629   : > { %v1996_v61 = vadd.f32 %v3796_v51, %v1974_v30 }
 0x62b   : > { %v2004_v36 = vmax.f32 %v1996_v61, 0.0  ;;  %v1906_v22 = vpop.permute.xlu1 %1905  ;;  %v1912_v26 = vpop.permute.xlu0 %1911 }
 0x62c   : > { %v1973_v51 = vsel %vm1972_vm1, %v1968_v9, %v1906_v22  ;;  %v1976_v14 = vsel %vm1972_vm1, %v1971_v7, %v1912_v26 }
 0x62d   : > { %2016 = vst.msk [vmem:[%s3841_s12 + $0x18] sm:$0xff] %vm2013_vm2, %v2004_v36  ;;  %v1994_v56 = vadd.f32 %v3794_v54, %v1973_v51  ;;  %v2000_v1 = vadd.f32 %v3800_v17, %v1976_v14 }
 0x62f   : > { %v2002_v35 = vmax.f32 %v1994_v56, 0.0  ;;  %v2008_v63 = vmax.f32 %v2000_v1, 0.0  ;;  %v1910_v8 = vpop.permute.xlu1 %1909 }
 0x630   : > { %v1975_v20 = vsel %vm1972_vm1, %v1970_v34, %v1910_v8 }
 0x631   : > { %2014 = vst.msk [vmem:[%s3841_s12 + $0x8] sm:$0xff] %vm2013_vm2, %v2002_v35  ;;  %2020 = vst.msk [vmem:[%s3841_s12 + $0x38] sm:$0xff] %vm2013_vm2, %v2008_v63  ;;  %v1998_v16 = vadd.f32 %v3798_v32, %v1975_v20  ;;  %19 = sbr.rel (!%p17_p0) target bundleno = 4 (0x4), region = 38 }
 0x633   : > { %v2006_v54 = vmax.f32 %v1998_v16, 0.0 }
 0x635   : > { %2018 = vst.msk [vmem:[%s3841_s12 + $0x28] sm:$0xff] %vm2013_vm2, %v2006_v54 }

</bundles_post_ra>
